<compile_context>
chip_gen: v7x
topology: tpu7x:2x2x1
jax: 0.10.0
libtpu: 0.0.40
codegen_flags: <defaults>
</compile_context>

<pallas_src>
import functools
import numpy as np
import jax
import jax.numpy as jnp
from jax import lax
from jax.experimental import pallas as pl
from jax.experimental.pallas import tpu as pltpu

# ----------------------- synthetic config (small shapes) -----------------------
CONFIG = {
    "max_seq_len": 8,
    "transformer": {
        "decoder_hidden": 32,
        "decoder_layer": 2,
        "decoder_head": 2,
        "conv_filter_size": 64,
        "conv_kernel_size": [3, 1],
        "decoder_dropout": 0.2,  # TODO(synk): dropout is identity in eval mode (no RNG in kernel)
    },
}


# ----------------------- sinusoid table (matches reference) -----------------------
def get_sinusoid_encoding_table(n_position, d_hid, padding_idx=None):
    def cal_angle(position, hid_idx):
        return position / np.power(10000, 2 * (hid_idx // 2) / d_hid)

    def get_posi_angle_vec(position):
        return [cal_angle(position, hid_j) for hid_j in range(d_hid)]

    table = np.array([get_posi_angle_vec(pos_i) for pos_i in range(n_position)])
    table[:, 0::2] = np.sin(table[:, 0::2])
    table[:, 1::2] = np.cos(table[:, 1::2])
    if padding_idx is not None:
        table[padding_idx] = 0.0
    return table.astype(np.float32)


# ----------------------- fused decoder kernel (one sequence per grid step) -----------------------
def decoder_kernel(len_ref,                                   # SMEM (B,) int32 seq lengths
                   x_ref, pos_ref,                            # (T, D), (T, D)
                   wqkv_ref, bqkv_ref, wo_ref, bo_ref,        # (L,D,3*HK) bf16, (L,1,3*HK), (L,HV,D) bf16, (L,1,D)
                   ln1g_ref, ln1b_ref,                        # (L,1,D)
                   w1_ref, b1_ref, w2_ref, b2_ref,            # (L,k1*D,Di) bf16, (L,1,Di), (L,k2*Di,D) bf16, (L,1,D)
                   ln2g_ref, ln2b_ref,                        # (L,1,D)
                   out_ref,                                   # (T, D)
                   *, n_layers, n_head, d_k, d_v, k1, k2, T):
    HK = n_head * d_k
    HV = n_head * d_v
    b = pl.program_id(0)
    seqlen = len_ref[b]

    # positional encoding added in-kernel (no batch broadcast needed: one sequence per step)
    x = x_ref[...] + pos_ref[...]                                            # (T, D) f32

    # padding masks built once from the sequence length (True = padded)
    t_iota = lax.broadcasted_iota(jnp.int32, (T, 1), 0)
    qpad = t_iota >= seqlen                                                  # (T, 1)  time mask
    kpad = lax.broadcasted_iota(jnp.int32, (1, 1, T), 2) >= seqlen           # (1, 1, T) key mask

    def layer_norm(v, g, beta, eps=1e-5):
        mu = jnp.mean(v, axis=-1, keepdims=True)
        var = jnp.mean((v - mu) ** 2, axis=-1, keepdims=True)
        return (v - mu) * lax.rsqrt(var + eps) * g + beta

    def split_heads(m2d, dh):
        # (T, H*dh) -> (H, T, dh), cast to bf16 for the MXU
        return jnp.transpose(m2d.reshape(T, n_head, dh), (1, 0, 2)).astype(jnp.bfloat16)

    def shifted(v, s):
        # rows shifted by s time steps within the sequence, zero-padded at the edges
        if s == 0:
            return v
        z = jnp.zeros((abs(s), v.shape[1]), v.dtype)
        if s > 0:
            return jnp.concatenate([v[s:, :], z], axis=0)
        return jnp.concatenate([z, v[:s, :]], axis=0)

    for l in range(n_layers):                                  # unrolled (n_layers static & tiny)
        # ---------------- multi-head self-attention (heads batched in one einsum pair) ----------------
        residual = x
        qkv = jnp.dot(x.astype(jnp.bfloat16), wqkv_ref[l],
                      preferred_element_type=jnp.float32) + bqkv_ref[l]      # (T, 3*HK)
        q = split_heads(qkv[:, :HK], d_k)                                    # (H, T, d_k); 1/temp folded in wq
        k = split_heads(qkv[:, HK:2 * HK], d_k)                              # (H, T, d_k)
        v = split_heads(qkv[:, 2 * HK:2 * HK + HV], d_v)                     # (H, T, d_v)

        scores = jnp.einsum('hqd,hkd->hqk', q, k,
                            preferred_element_type=jnp.float32)              # (H, T, T)
        # reference uses masked_fill(mask, -inf); -1e9 is equivalent here
        scores = jnp.where(kpad, -1e9, scores)
        m = jnp.max(scores, axis=-1, keepdims=True)
        e = jnp.exp(scores - m)
        attn = e * pl.reciprocal(jnp.sum(e, axis=-1, keepdims=True), approx=True)
        ctx = jnp.einsum('hqk,hkd->hqd', attn.astype(jnp.bfloat16), v,
                         preferred_element_type=jnp.float32)                 # (H, T, d_v)
        ctx = jnp.transpose(ctx, (1, 0, 2)).reshape(T, HV)                   # (T, H*d_v)

        proj = jnp.dot(ctx.astype(jnp.bfloat16), wo_ref[l],
                       preferred_element_type=jnp.float32) + bo_ref[l]
        x = layer_norm(proj + residual, ln1g_ref[l], ln1b_ref[l])
        x = jnp.where(qpad, 0.0, x)

        # ---------------- position-wise conv1d FFN ('same' padding), taps fused into one matmul ----------------
        residual = x
        p1 = (k1 - 1) // 2
        conv_in = jnp.concatenate([shifted(x, j - p1) for j in range(k1)],
                                  axis=-1).astype(jnp.bfloat16)              # (T, k1*D)
        h1 = jnp.dot(conv_in, w1_ref[l], preferred_element_type=jnp.float32) + b1_ref[l]
        h1 = jnp.maximum(h1, 0.0)

        p2 = (k2 - 1) // 2
        conv_in2 = jnp.concatenate([shifted(h1, j - p2) for j in range(k2)],
                                   axis=-1).astype(jnp.bfloat16)             # (T, k2*Di)
        h2 = jnp.dot(conv_in2, w2_ref[l], preferred_element_type=jnp.float32) + b2_ref[l]

        x = layer_norm(h2 + residual, ln2g_ref[l], ln2b_ref[l])
        x = jnp.where(qpad, 0.0, x)

    out_ref[...] = x


# ----------------------- Decoder forward (single fused pallas_call) -----------------------
def decoder_forward(enc_seq, mask_bool, pos_table, layer_params, cfg):
    tcfg = cfg["transformer"]
    B, seq_len, D = enc_seq.shape
    T = min(seq_len, cfg["max_seq_len"])
    H = tcfg["decoder_head"]
    d_k = d_v = D // H
    HK, HV = H * d_k, H * d_v
    k1, k2 = tcfg["conv_kernel_size"]
    L = len(layer_params)
    inv_temp = float(1.0 / np.sqrt(d_k))

    mask = mask_bool[:, :T]
    # The decoder's mask is a length/padding mask (True for the padded tail): pass it to the
    # kernel compactly as per-sequence lengths via scalar prefetch (SMEM).
    lengths = jnp.sum(jnp.logical_not(mask), axis=1).astype(jnp.int32)       # (B,)

    x = enc_seq[:, :T, :].astype(jnp.float32)                                # (B, T, D)
    pos = pos_table[:T, :].astype(jnp.float32)                               # (T, D)

    bf16 = jnp.bfloat16

    def stack(fn, dtype=jnp.float32):
        return jnp.stack([fn(p) for p in layer_params], axis=0).astype(dtype)

    # Fused QKV projection across heads; 1/sqrt(d_k) folded into the Q weights/bias.
    def qkv_w(p):
        wq = jnp.transpose(p["wq"], (1, 0, 2)).reshape(D, HK) * inv_temp
        wk = jnp.transpose(p["wk"], (1, 0, 2)).reshape(D, HK)
        wv = jnp.transpose(p["wv"], (1, 0, 2)).reshape(D, HV)
        return jnp.concatenate([wq, wk, wv], axis=-1)

    def qkv_b(p):
        bq = jnp.transpose(p["bq"], (1, 0, 2)).reshape(1, HK) * inv_temp
        bk = jnp.transpose(p["bk"], (1, 0, 2)).reshape(1, HK)
        bv = jnp.transpose(p["bv"], (1, 0, 2)).reshape(1, HV)
        return jnp.concatenate([bq, bk, bv], axis=-1)

    wqkv = stack(qkv_w, bf16)                                                # (L, D, 3*HK)
    bqkv = stack(qkv_b)                                                      # (L, 1, 3*HK)
    wo = stack(lambda p: p["wo"].reshape(HV, D), bf16)                       # (L, HV, D)
    bo = stack(lambda p: p["bo"])                                            # (L, 1, D)
    ln1g = stack(lambda p: p["ln1g"]); ln1b = stack(lambda p: p["ln1b"])
    w1 = stack(lambda p: p["w1"].reshape(k1 * D, p["w1"].shape[-1]), bf16)   # (L, k1*D, Di)
    b1 = stack(lambda p: p["b1"])                                            # (L, 1, Di)
    w2 = stack(lambda p: p["w2"].reshape(k2 * p["w2"].shape[1], D), bf16)    # (L, k2*Di, D)
    b2 = stack(lambda p: p["b2"])
    ln2g = stack(lambda p: p["ln2g"]); ln2b = stack(lambda p: p["ln2b"])

    operands = (x, pos, wqkv, bqkv, wo, bo, ln1g, ln1b, w1, b1, w2, b2, ln2g, ln2b)

    kern = functools.partial(decoder_kernel, n_layers=L, n_head=H, d_k=d_k, d_v=d_v,
                             k1=k1, k2=k2, T=T)

    def resident_spec(a):
        # full-array block with constant index_map: stays resident across grid steps
        return pl.BlockSpec(a.shape, lambda b, lens, _nd=a.ndim: (0,) * _nd)

    in_specs = [
        pl.BlockSpec((None, T, D), lambda b, lens: (b, 0, 0)),               # one sequence per step
        pl.BlockSpec((T, D), lambda b, lens: (0, 0)),                        # positional table
    ] + [resident_spec(a) for a in operands[2:]]

    out = pl.pallas_call(
        kern,
        out_shape=jax.ShapeDtypeStruct((B, T, D), jnp.float32),
        grid_spec=pltpu.PrefetchScalarGridSpec(
            num_scalar_prefetch=1,
            grid=(B,),                                                       # batch-parallel grid
            in_specs=in_specs,
            out_specs=pl.BlockSpec((None, T, D), lambda b, lens: (b, 0, 0)),
        ),
        compiler_params=pltpu.CompilerParams(dimension_semantics=("parallel",)),
    )(lengths, *operands)

    return out, mask


# ----------------------- parameters -----------------------
def init_layer_params(key, D, H, d_k, d_v, d_inner, k1, k2):
    ks = jax.random.split(key, 16)
    n = lambda k, shape, s: jax.random.normal(k, shape, dtype=jnp.float32) * s
    return {
        "wq": n(ks[0], (H, D, d_k), 1.0 / np.sqrt(D)),
        "bq": n(ks[1], (H, 1, d_k), 0.02),
        "wk": n(ks[2], (H, D, d_k), 1.0 / np.sqrt(D)),
        "bk": n(ks[3], (H, 1, d_k), 0.02),
        "wv": n(ks[4], (H, D, d_v), 1.0 / np.sqrt(D)),
        "bv": n(ks[5], (H, 1, d_v), 0.02),
        "wo": n(ks[6], (H, d_v, D), 1.0 / np.sqrt(H * d_v)),
        "bo": n(ks[7], (1, D), 0.02),
        "ln1g": jnp.ones((1, D), jnp.float32) + n(ks[8], (1, D), 0.01),
        "ln1b": n(ks[9], (1, D), 0.01),
        "w1": n(ks[10], (k1, D, d_inner), 1.0 / np.sqrt(D * k1)),
        "b1": n(ks[11], (1, d_inner), 0.02),
        "w2": n(ks[12], (k2, d_inner, D), 1.0 / np.sqrt(d_inner * k2)),
        "b2": n(ks[13], (1, D), 0.02),
        "ln2g": jnp.ones((1, D), jnp.float32) + n(ks[14], (1, D), 0.01),
        "ln2b": n(ks[15], (1, D), 0.01),
    }


# ----------------------- pure-JAX reference (for correctness check) -----------------------
def _ln_ref(x, g, b, eps=1e-5):
    mu = jnp.mean(x, axis=-1, keepdims=True)
    var = jnp.mean((x - mu) ** 2, axis=-1, keepdims=True)
    return (x - mu) / jnp.sqrt(var + eps) * g + b


def reference_forward(enc_seq, mask_bool, pos_table, layer_params, cfg):
    tcfg = cfg["transformer"]
    B, seq_len, D = enc_seq.shape
    H = tcfg["decoder_head"]
    d_k = D // H
    k1, k2 = tcfg["conv_kernel_size"]
    T = min(seq_len, cfg["max_seq_len"])

    x = enc_seq[:, :T, :] + pos_table[None, :T, :]
    mask = mask_bool[:, :T]
    kmask = mask[:, None, :]
    qmask = mask[:, :, None]
    temp = np.sqrt(d_k)

    for p in layer_params:
        residual = x
        acc = jnp.zeros_like(x)
        for h in range(H):
            q = x @ p["wq"][h] + p["bq"][h]
            k_ = x @ p["wk"][h] + p["bk"][h]
            v = x @ p["wv"][h] + p["bv"][h]
            scores = jnp.einsum("btk,bsk->bts", q, k_) / temp
            scores = jnp.where(kmask, -1e9, scores)
            attn = jax.nn.softmax(scores, axis=-1)
            acc = acc + jnp.einsum("bts,bsd->btd", attn, v) @ p["wo"][h]
        acc = acc + p["bo"]
        x = _ln_ref(acc + residual, p["ln1g"], p["ln1b"])
        x = jnp.where(qmask, 0.0, x)

        residual = x
        pp1 = (k1 - 1) // 2
        xp = jnp.pad(x, ((0, 0), (pp1, pp1), (0, 0)))
        h1 = sum(xp[:, j:j + T, :] @ p["w1"][j] for j in range(k1)) + p["b1"]
        h1 = jnp.maximum(h1, 0.0)
        pp2 = (k2 - 1) // 2
        hp = jnp.pad(h1, ((0, 0), (pp2, pp2), (0, 0)))
        h2 = sum(hp[:, j:j + T, :] @ p["w2"][j] for j in range(k2)) + p["b2"]
        x = _ln_ref(h2 + residual, p["ln2g"], p["ln2b"])
        x = jnp.where(qmask, 0.0, x)
    return x, mask


# ----------------------- main -----------------------
if __name__ == "__main__":
    cfg = CONFIG
    tcfg = cfg["transformer"]
    B, T, D = 2, cfg["max_seq_len"], tcfg["decoder_hidden"]
    H = tcfg["decoder_head"]
    d_k = d_v = D // H
    d_inner = tcfg["conv_filter_size"]
    k1, k2 = tcfg["conv_kernel_size"]

    key = jax.random.PRNGKey(0)
    k_in, k_par = jax.random.split(key)
    enc_seq = jax.random.normal(k_in, (B, T, D), dtype=jnp.float32)
    lengths = jnp.array([T, T - 2], dtype=jnp.int32)
    mask_bool = jnp.arange(T)[None, :] >= lengths[:, None]   # True = padded position

    pos_table = jnp.asarray(get_sinusoid_encoding_table(cfg["max_seq_len"] + 1, D))

    layer_params = [
        init_layer_params(jax.random.fold_in(k_par, l), D, H, d_k, d_v, d_inner, k1, k2)
        for l in range(tcfg["decoder_layer"])
    ]

    fwd = jax.jit(functools.partial(decoder_forward, cfg=cfg))
    out, out_mask = fwd(enc_seq, mask_bool, pos_table, layer_params)
    out = jax.block_until_ready(out)

    ref_out, _ = reference_forward(enc_seq, mask_bool, pos_table, layer_params, cfg)
    ref_out = jax.block_until_ready(ref_out)

    assert out.shape == (B, T, D)
    max_diff = float(jnp.max(jnp.abs(out - ref_out)))
    # bf16 MXU operands + approx-reciprocal softmax denominator => slightly looser
    # tolerance than a pure-f32 kernel (f32 reference); typical max diff is well below this.
    assert np.isfinite(max_diff) and max_diff < 1e-1, f"mismatch vs reference: {max_diff}"
    print("KERNEL_OK")
</pallas_src>

<mosaic_0001>
module attributes {stable_mosaic.version = 11 : i64} {
  func.func @decoder_kernel(%arg0: i32, %arg1: memref<2xi32, #tpu.memory_space<smem>>, %arg2: memref<1x8x32xf32, #tpu.memory_space<vmem>>, %arg3: memref<8x32xf32, #tpu.memory_space<vmem>>, %arg4: memref<2x32x96xbf16, #tpu.memory_space<vmem>>, %arg5: memref<2x1x96xf32, #tpu.memory_space<vmem>>, %arg6: memref<2x32x32xbf16, #tpu.memory_space<vmem>>, %arg7: memref<2x1x32xf32, #tpu.memory_space<vmem>>, %arg8: memref<2x1x32xf32, #tpu.memory_space<vmem>>, %arg9: memref<2x1x32xf32, #tpu.memory_space<vmem>>, %arg10: memref<2x96x64xbf16, #tpu.memory_space<vmem>>, %arg11: memref<2x1x64xf32, #tpu.memory_space<vmem>>, %arg12: memref<2x64x32xbf16, #tpu.memory_space<vmem>>, %arg13: memref<2x1x32xf32, #tpu.memory_space<vmem>>, %arg14: memref<2x1x32xf32, #tpu.memory_space<vmem>>, %arg15: memref<2x1x32xf32, #tpu.memory_space<vmem>>, %arg16: memref<1x8x32xf32, #tpu.memory_space<vmem>>) attributes {dimension_semantics = [#tpu.dimension_semantics<parallel>], iteration_bounds = array<i64: 2>, scalar_prefetch = 1 : i64, scratch_operands = 0 : i64, tpu.core_type = #tpu.core_type<tc>, window_params = [{transform_indices = @transform_0, window_bounds = array<i64: 1, 8, 32>}, {pipeline_mode = #tpu.pipeline_mode<synchronous>, transform_indices = @transform_1, window_bounds = array<i64: 8, 32>}, {pipeline_mode = #tpu.pipeline_mode<synchronous>, transform_indices = @transform_2, window_bounds = array<i64: 2, 32, 96>}, {pipeline_mode = #tpu.pipeline_mode<synchronous>, transform_indices = @transform_3, window_bounds = array<i64: 2, 1, 96>}, {pipeline_mode = #tpu.pipeline_mode<synchronous>, transform_indices = @transform_4, window_bounds = array<i64: 2, 32, 32>}, {pipeline_mode = #tpu.pipeline_mode<synchronous>, transform_indices = @transform_5, window_bounds = array<i64: 2, 1, 32>}, {pipeline_mode = #tpu.pipeline_mode<synchronous>, transform_indices = @transform_6, window_bounds = array<i64: 2, 1, 32>}, {pipeline_mode = #tpu.pipeline_mode<synchronous>, transform_indices = @transform_7, window_bounds = array<i64: 2, 1, 32>}, {pipeline_mode = #tpu.pipeline_mode<synchronous>, transform_indices = @transform_8, window_bounds = array<i64: 2, 96, 64>}, {pipeline_mode = #tpu.pipeline_mode<synchronous>, transform_indices = @transform_9, window_bounds = array<i64: 2, 1, 64>}, {pipeline_mode = #tpu.pipeline_mode<synchronous>, transform_indices = @transform_10, window_bounds = array<i64: 2, 64, 32>}, {pipeline_mode = #tpu.pipeline_mode<synchronous>, transform_indices = @transform_11, window_bounds = array<i64: 2, 1, 32>}, {pipeline_mode = #tpu.pipeline_mode<synchronous>, transform_indices = @transform_12, window_bounds = array<i64: 2, 1, 32>}, {pipeline_mode = #tpu.pipeline_mode<synchronous>, transform_indices = @transform_13, window_bounds = array<i64: 2, 1, 32>}, {transform_indices = @transform_14, window_bounds = array<i64: 1, 8, 32>}]} {
    %0 = arith.index_cast %arg0 : i32 to index
    %1 = memref.load %arg1[%0] : memref<2xi32, #tpu.memory_space<smem>>
    %c0 = arith.constant 0 : index
    %c0_0 = arith.constant 0 : index
    %c0_1 = arith.constant 0 : index
    %2 = vector.load %arg2[%c0, %c0_0, %c0_1] : memref<1x8x32xf32, #tpu.memory_space<vmem>>, vector<1x8x32xf32>
    %3 = vector.shape_cast %2 : vector<1x8x32xf32> to vector<8x32xf32>
    %c0_2 = arith.constant 0 : index
    %c0_3 = arith.constant 0 : index
    %4 = vector.load %arg3[%c0_2, %c0_3] : memref<8x32xf32, #tpu.memory_space<vmem>>, vector<8x32xf32>
    %5 = arith.addf %3, %4 : vector<8x32xf32>
    %6 = tpu.iota {dimensions = array<i32: 0>} : vector<8x1xi32>
    %7 = vector.broadcast %1 : i32 to vector<8x1xi32>
    %8 = arith.cmpi sge, %6, %7 : vector<8x1xi32>
    %9 = tpu.iota {dimensions = array<i32: 2>} : vector<1x1x8xi32>
    %10 = vector.broadcast %1 : i32 to vector<1x1x8xi32>
    %11 = arith.cmpi sge, %9, %10 : vector<1x1x8xi32>
    %12 = arith.truncf %5 : vector<8x32xf32> to vector<8x32xbf16>
    %c0_4 = arith.constant 0 : index
    %c0_5 = arith.constant 0 : index
    %c0_6 = arith.constant 0 : index
    %13 = vector.load %arg4[%c0_4, %c0_5, %c0_6] : memref<2x32x96xbf16, #tpu.memory_space<vmem>>, vector<1x32x96xbf16>
    %14 = vector.shape_cast %13 : vector<1x32x96xbf16> to vector<32x96xbf16>
    %cst = arith.constant dense<0.000000e+00> : vector<8x96xf32>
    %15 = tpu.matmul %12, %14, %cst {dimension_numbers = #tpu.dot_dimension_numbers<[1], [0], [0], [1], [0, 0, 1, 1], [], []>} : vector<8x32xbf16>, vector<32x96xbf16>, vector<8x96xf32> -> vector<8x96xf32>
    %c0_7 = arith.constant 0 : index
    %c0_8 = arith.constant 0 : index
    %c0_9 = arith.constant 0 : index
    %16 = vector.load %arg5[%c0_7, %c0_8, %c0_9] : memref<2x1x96xf32, #tpu.memory_space<vmem>>, vector<1x1x96xf32>
    %17 = vector.shape_cast %16 : vector<1x1x96xf32> to vector<1x96xf32>
    %18 = vector.broadcast %17 : vector<1x96xf32> to vector<8x96xf32>
    %19 = arith.addf %15, %18 : vector<8x96xf32>
    %20 = vector.extract_strided_slice %19 {offsets = [0, 0], sizes = [8, 32], strides = [1, 1]} : vector<8x96xf32> to vector<8x32xf32>
    %21 = vector.shape_cast %20 : vector<8x32xf32> to vector<8x2x16xf32>
    %22 = tpu.transpose %21, [1, 0, 2] : vector<8x2x16xf32> -> vector<2x8x16xf32>
    %23 = arith.truncf %22 : vector<2x8x16xf32> to vector<2x8x16xbf16>
    %24 = vector.extract_strided_slice %19 {offsets = [0, 32], sizes = [8, 32], strides = [1, 1]} : vector<8x96xf32> to vector<8x32xf32>
    %25 = vector.shape_cast %24 : vector<8x32xf32> to vector<8x2x16xf32>
    %26 = tpu.transpose %25, [1, 0, 2] : vector<8x2x16xf32> -> vector<2x8x16xf32>
    %27 = arith.truncf %26 : vector<2x8x16xf32> to vector<2x8x16xbf16>
    %28 = vector.extract_strided_slice %19 {offsets = [0, 64], sizes = [8, 32], strides = [1, 1]} : vector<8x96xf32> to vector<8x32xf32>
    %29 = vector.shape_cast %28 : vector<8x32xf32> to vector<8x2x16xf32>
    %30 = tpu.transpose %29, [1, 0, 2] : vector<8x2x16xf32> -> vector<2x8x16xf32>
    %31 = arith.truncf %30 : vector<2x8x16xf32> to vector<2x8x16xbf16>
    "tpu.trace_start"() <{level = 10 : i32, message = "hqd,hkd->hqk"}> : () -> ()
    %cst_10 = arith.constant dense<0.000000e+00> : vector<2x8x8xf32>
    %32 = tpu.matmul %23, %27, %cst_10 {dimension_numbers = #tpu.dot_dimension_numbers<[2], [2], [1], [1], [0, 0, 0, 1, 1, 1], [0], [0]>} : vector<2x8x16xbf16>, vector<2x8x16xbf16>, vector<2x8x8xf32> -> vector<2x8x8xf32>
    %cst_11 = arith.constant -1.000000e+09 : f32
    "tpu.trace_stop"() : () -> ()
    %33 = vector.shape_cast %11 : vector<1x1x8xi1> to vector<1x1x8xi1>
    %34 = vector.broadcast %33 : vector<1x1x8xi1> to vector<2x8x8xi1>
    %35 = vector.broadcast %cst_11 : f32 to vector<2x8x8xf32>
    %36 = arith.select %34, %35, %32 : vector<2x8x8xi1>, vector<2x8x8xf32>
    %cst_12 = arith.constant dense<0xFF800000> : vector<2x8xf32>
    %37 = vector.multi_reduction <maximumf>, %36, %cst_12 [2] : vector<2x8x8xf32> to vector<2x8xf32>
    %38 = vector.shape_cast %37 : vector<2x8xf32> to vector<2x8x1xf32>
    %39 = vector.broadcast %38 : vector<2x8x1xf32> to vector<2x8x8xf32>
    %40 = arith.subf %36, %39 : vector<2x8x8xf32>
    %41 = math.exp %40 : vector<2x8x8xf32>
    %cst_13 = arith.constant dense<0.000000e+00> : vector<2x8xf32>
    %42 = vector.multi_reduction <add>, %41, %cst_13 [2] : vector<2x8x8xf32> to vector<2x8xf32>
    %43 = vector.shape_cast %42 : vector<2x8xf32> to vector<2x8x1xf32>
    %44 = tpu.reciprocal %43 {approx = true} : vector<2x8x1xf32> -> vector<2x8x1xf32>
    %45 = vector.broadcast %44 : vector<2x8x1xf32> to vector<2x8x8xf32>
    %46 = arith.mulf %41, %45 : vector<2x8x8xf32>
    %47 = arith.truncf %46 : vector<2x8x8xf32> to vector<2x8x8xbf16>
    "tpu.trace_start"() <{level = 10 : i32, message = "hqk,hkd->hqd"}> : () -> ()
    %cst_14 = arith.constant dense<0.000000e+00> : vector<2x8x16xf32>
    %48 = tpu.matmul %47, %31, %cst_14 {dimension_numbers = #tpu.dot_dimension_numbers<[2], [1], [1], [2], [0, 0, 0, 1, 1, 2], [0], [0]>} : vector<2x8x8xbf16>, vector<2x8x16xbf16>, vector<2x8x16xf32> -> vector<2x8x16xf32>
    "tpu.trace_stop"() : () -> ()
    %49 = tpu.transpose %48, [1, 0, 2] : vector<2x8x16xf32> -> vector<8x2x16xf32>
    %50 = vector.shape_cast %49 : vector<8x2x16xf32> to vector<8x32xf32>
    %51 = arith.truncf %50 : vector<8x32xf32> to vector<8x32xbf16>
    %c0_15 = arith.constant 0 : index
    %c0_16 = arith.constant 0 : index
    %c0_17 = arith.constant 0 : index
    %52 = vector.load %arg6[%c0_15, %c0_16, %c0_17] : memref<2x32x32xbf16, #tpu.memory_space<vmem>>, vector<1x32x32xbf16>
    %53 = vector.shape_cast %52 : vector<1x32x32xbf16> to vector<32x32xbf16>
    %cst_18 = arith.constant dense<0.000000e+00> : vector<8x32xf32>
    %54 = tpu.matmul %51, %53, %cst_18 {dimension_numbers = #tpu.dot_dimension_numbers<[1], [0], [0], [1], [0, 0, 1, 1], [], []>} : vector<8x32xbf16>, vector<32x32xbf16>, vector<8x32xf32> -> vector<8x32xf32>
    %c0_19 = arith.constant 0 : index
    %c0_20 = arith.constant 0 : index
    %c0_21 = arith.constant 0 : index
    %55 = vector.load %arg7[%c0_19, %c0_20, %c0_21] : memref<2x1x32xf32, #tpu.memory_space<vmem>>, vector<1x1x32xf32>
    %56 = vector.shape_cast %55 : vector<1x1x32xf32> to vector<1x32xf32>
    %57 = vector.broadcast %56 : vector<1x32xf32> to vector<8x32xf32>
    %58 = arith.addf %54, %57 : vector<8x32xf32>
    %59 = arith.addf %58, %5 : vector<8x32xf32>
    %c0_22 = arith.constant 0 : index
    %c0_23 = arith.constant 0 : index
    %c0_24 = arith.constant 0 : index
    %60 = vector.load %arg8[%c0_22, %c0_23, %c0_24] : memref<2x1x32xf32, #tpu.memory_space<vmem>>, vector<1x1x32xf32>
    %61 = vector.shape_cast %60 : vector<1x1x32xf32> to vector<1x32xf32>
    %c0_25 = arith.constant 0 : index
    %c0_26 = arith.constant 0 : index
    %c0_27 = arith.constant 0 : index
    %62 = vector.load %arg9[%c0_25, %c0_26, %c0_27] : memref<2x1x32xf32, #tpu.memory_space<vmem>>, vector<1x1x32xf32>
    %63 = vector.shape_cast %62 : vector<1x1x32xf32> to vector<1x32xf32>
    %cst_28 = arith.constant dense<0.000000e+00> : vector<8xf32>
    %64 = vector.multi_reduction <add>, %59, %cst_28 [1] : vector<8x32xf32> to vector<8xf32>
    %65 = vector.shape_cast %64 : vector<8xf32> to vector<8x1xf32>
    %cst_29 = arith.constant 3.200000e+01 : f32
    %66 = vector.broadcast %cst_29 : f32 to vector<8x1xf32>
    %67 = arith.divf %65, %66 : vector<8x1xf32>
    %68 = vector.broadcast %67 : vector<8x1xf32> to vector<8x32xf32>
    %69 = arith.subf %59, %68 : vector<8x32xf32>
    %70 = arith.mulf %69, %69 : vector<8x32xf32>
    %cst_30 = arith.constant dense<0.000000e+00> : vector<8xf32>
    %71 = vector.multi_reduction <add>, %70, %cst_30 [1] : vector<8x32xf32> to vector<8xf32>
    %72 = vector.shape_cast %71 : vector<8xf32> to vector<8x1xf32>
    %cst_31 = arith.constant 3.200000e+01 : f32
    %73 = vector.broadcast %cst_31 : f32 to vector<8x1xf32>
    %74 = arith.divf %72, %73 : vector<8x1xf32>
    %75 = vector.broadcast %67 : vector<8x1xf32> to vector<8x32xf32>
    %76 = arith.subf %59, %75 : vector<8x32xf32>
    %cst_32 = arith.constant 9.99999974E-6 : f32
    %77 = vector.broadcast %cst_32 : f32 to vector<8x1xf32>
    %78 = arith.addf %74, %77 : vector<8x1xf32>
    %79 = math.rsqrt %78 : vector<8x1xf32>
    %80 = vector.broadcast %79 : vector<8x1xf32> to vector<8x32xf32>
    %81 = arith.mulf %76, %80 : vector<8x32xf32>
    %82 = vector.broadcast %61 : vector<1x32xf32> to vector<8x32xf32>
    %83 = arith.mulf %81, %82 : vector<8x32xf32>
    %84 = vector.broadcast %63 : vector<1x32xf32> to vector<8x32xf32>
    %85 = arith.addf %83, %84 : vector<8x32xf32>
    %cst_33 = arith.constant 0.000000e+00 : f32
    %86 = vector.shape_cast %8 : vector<8x1xi1> to vector<8x1xi1>
    %87 = vector.broadcast %86 : vector<8x1xi1> to vector<8x32xi1>
    %88 = vector.broadcast %cst_33 : f32 to vector<8x32xf32>
    %89 = arith.select %87, %88, %85 : vector<8x32xi1>, vector<8x32xf32>
    %cst_34 = arith.constant 0.000000e+00 : f32
    %90 = vector.broadcast %cst_34 : f32 to vector<1x32xf32>
    %91 = vector.extract_strided_slice %89 {offsets = [0, 0], sizes = [7, 32], strides = [1, 1]} : vector<8x32xf32> to vector<7x32xf32>
    %92 = tpu.concatenate %90, %91 in 0 : vector<1x32xf32>, vector<7x32xf32> -> vector<8x32xf32>
    %cst_35 = arith.constant 0.000000e+00 : f32
    %93 = vector.broadcast %cst_35 : f32 to vector<1x32xf32>
    %94 = vector.extract_strided_slice %89 {offsets = [1, 0], sizes = [7, 32], strides = [1, 1]} : vector<8x32xf32> to vector<7x32xf32>
    %95 = tpu.concatenate %94, %93 in 0 : vector<7x32xf32>, vector<1x32xf32> -> vector<8x32xf32>
    %96 = tpu.concatenate %92, %89, %95 in 1 : vector<8x32xf32>, vector<8x32xf32>, vector<8x32xf32> -> vector<8x96xf32>
    %97 = arith.truncf %96 : vector<8x96xf32> to vector<8x96xbf16>
    %c0_36 = arith.constant 0 : index
    %c0_37 = arith.constant 0 : index
    %c0_38 = arith.constant 0 : index
    %98 = vector.load %arg10[%c0_36, %c0_37, %c0_38] : memref<2x96x64xbf16, #tpu.memory_space<vmem>>, vector<1x96x64xbf16>
    %99 = vector.shape_cast %98 : vector<1x96x64xbf16> to vector<96x64xbf16>
    %cst_39 = arith.constant dense<0.000000e+00> : vector<8x64xf32>
    %100 = tpu.matmul %97, %99, %cst_39 {dimension_numbers = #tpu.dot_dimension_numbers<[1], [0], [0], [1], [0, 0, 1, 1], [], []>} : vector<8x96xbf16>, vector<96x64xbf16>, vector<8x64xf32> -> vector<8x64xf32>
    %c0_40 = arith.constant 0 : index
    %c0_41 = arith.constant 0 : index
    %c0_42 = arith.constant 0 : index
    %101 = vector.load %arg11[%c0_40, %c0_41, %c0_42] : memref<2x1x64xf32, #tpu.memory_space<vmem>>, vector<1x1x64xf32>
    %102 = vector.shape_cast %101 : vector<1x1x64xf32> to vector<1x64xf32>
    %103 = vector.broadcast %102 : vector<1x64xf32> to vector<8x64xf32>
    %104 = arith.addf %100, %103 : vector<8x64xf32>
    %cst_43 = arith.constant 0.000000e+00 : f32
    %105 = vector.broadcast %cst_43 : f32 to vector<8x64xf32>
    %106 = arith.maximumf %104, %105 : vector<8x64xf32>
    %107 = arith.truncf %106 : vector<8x64xf32> to vector<8x64xbf16>
    %c0_44 = arith.constant 0 : index
    %c0_45 = arith.constant 0 : index
    %c0_46 = arith.constant 0 : index
    %108 = vector.load %arg12[%c0_44, %c0_45, %c0_46] : memref<2x64x32xbf16, #tpu.memory_space<vmem>>, vector<1x64x32xbf16>
    %109 = vector.shape_cast %108 : vector<1x64x32xbf16> to vector<64x32xbf16>
    %cst_47 = arith.constant dense<0.000000e+00> : vector<8x32xf32>
    %110 = tpu.matmul %107, %109, %cst_47 {dimension_numbers = #tpu.dot_dimension_numbers<[1], [0], [0], [1], [0, 0, 1, 1], [], []>} : vector<8x64xbf16>, vector<64x32xbf16>, vector<8x32xf32> -> vector<8x32xf32>
    %c0_48 = arith.constant 0 : index
    %c0_49 = arith.constant 0 : index
    %c0_50 = arith.constant 0 : index
    %111 = vector.load %arg13[%c0_48, %c0_49, %c0_50] : memref<2x1x32xf32, #tpu.memory_space<vmem>>, vector<1x1x32xf32>
    %112 = vector.shape_cast %111 : vector<1x1x32xf32> to vector<1x32xf32>
    %113 = vector.broadcast %112 : vector<1x32xf32> to vector<8x32xf32>
    %114 = arith.addf %110, %113 : vector<8x32xf32>
    %115 = arith.addf %114, %89 : vector<8x32xf32>
    %c0_51 = arith.constant 0 : index
    %c0_52 = arith.constant 0 : index
    %c0_53 = arith.constant 0 : index
    %116 = vector.load %arg14[%c0_51, %c0_52, %c0_53] : memref<2x1x32xf32, #tpu.memory_space<vmem>>, vector<1x1x32xf32>
    %117 = vector.shape_cast %116 : vector<1x1x32xf32> to vector<1x32xf32>
    %c0_54 = arith.constant 0 : index
    %c0_55 = arith.constant 0 : index
    %c0_56 = arith.constant 0 : index
    %118 = vector.load %arg15[%c0_54, %c0_55, %c0_56] : memref<2x1x32xf32, #tpu.memory_space<vmem>>, vector<1x1x32xf32>
    %119 = vector.shape_cast %118 : vector<1x1x32xf32> to vector<1x32xf32>
    %cst_57 = arith.constant dense<0.000000e+00> : vector<8xf32>
    %120 = vector.multi_reduction <add>, %115, %cst_57 [1] : vector<8x32xf32> to vector<8xf32>
    %121 = vector.shape_cast %120 : vector<8xf32> to vector<8x1xf32>
    %cst_58 = arith.constant 3.200000e+01 : f32
    %122 = vector.broadcast %cst_58 : f32 to vector<8x1xf32>
    %123 = arith.divf %121, %122 : vector<8x1xf32>
    %124 = vector.broadcast %123 : vector<8x1xf32> to vector<8x32xf32>
    %125 = arith.subf %115, %124 : vector<8x32xf32>
    %126 = arith.mulf %125, %125 : vector<8x32xf32>
    %cst_59 = arith.constant dense<0.000000e+00> : vector<8xf32>
    %127 = vector.multi_reduction <add>, %126, %cst_59 [1] : vector<8x32xf32> to vector<8xf32>
    %128 = vector.shape_cast %127 : vector<8xf32> to vector<8x1xf32>
    %cst_60 = arith.constant 3.200000e+01 : f32
    %129 = vector.broadcast %cst_60 : f32 to vector<8x1xf32>
    %130 = arith.divf %128, %129 : vector<8x1xf32>
    %131 = vector.broadcast %123 : vector<8x1xf32> to vector<8x32xf32>
    %132 = arith.subf %115, %131 : vector<8x32xf32>
    %cst_61 = arith.constant 9.99999974E-6 : f32
    %133 = vector.broadcast %cst_61 : f32 to vector<8x1xf32>
    %134 = arith.addf %130, %133 : vector<8x1xf32>
    %135 = math.rsqrt %134 : vector<8x1xf32>
    %136 = vector.broadcast %135 : vector<8x1xf32> to vector<8x32xf32>
    %137 = arith.mulf %132, %136 : vector<8x32xf32>
    %138 = vector.broadcast %117 : vector<1x32xf32> to vector<8x32xf32>
    %139 = arith.mulf %137, %138 : vector<8x32xf32>
    %140 = vector.broadcast %119 : vector<1x32xf32> to vector<8x32xf32>
    %141 = arith.addf %139, %140 : vector<8x32xf32>
    %cst_62 = arith.constant 0.000000e+00 : f32
    %142 = vector.shape_cast %8 : vector<8x1xi1> to vector<8x1xi1>
    %143 = vector.broadcast %142 : vector<8x1xi1> to vector<8x32xi1>
    %144 = vector.broadcast %cst_62 : f32 to vector<8x32xf32>
    %145 = arith.select %143, %144, %141 : vector<8x32xi1>, vector<8x32xf32>
    %146 = arith.truncf %145 : vector<8x32xf32> to vector<8x32xbf16>
    %c1 = arith.constant 1 : index
    %c0_63 = arith.constant 0 : index
    %c0_64 = arith.constant 0 : index
    %147 = vector.load %arg4[%c1, %c0_63, %c0_64] : memref<2x32x96xbf16, #tpu.memory_space<vmem>>, vector<1x32x96xbf16>
    %148 = vector.shape_cast %147 : vector<1x32x96xbf16> to vector<32x96xbf16>
    %cst_65 = arith.constant dense<0.000000e+00> : vector<8x96xf32>
    %149 = tpu.matmul %146, %148, %cst_65 {dimension_numbers = #tpu.dot_dimension_numbers<[1], [0], [0], [1], [0, 0, 1, 1], [], []>} : vector<8x32xbf16>, vector<32x96xbf16>, vector<8x96xf32> -> vector<8x96xf32>
    %c1_66 = arith.constant 1 : index
    %c0_67 = arith.constant 0 : index
    %c0_68 = arith.constant 0 : index
    %150 = vector.load %arg5[%c1_66, %c0_67, %c0_68] : memref<2x1x96xf32, #tpu.memory_space<vmem>>, vector<1x1x96xf32>
    %151 = vector.shape_cast %150 : vector<1x1x96xf32> to vector<1x96xf32>
    %152 = vector.broadcast %151 : vector<1x96xf32> to vector<8x96xf32>
    %153 = arith.addf %149, %152 : vector<8x96xf32>
    %154 = vector.extract_strided_slice %153 {offsets = [0, 0], sizes = [8, 32], strides = [1, 1]} : vector<8x96xf32> to vector<8x32xf32>
    %155 = vector.shape_cast %154 : vector<8x32xf32> to vector<8x2x16xf32>
    %156 = tpu.transpose %155, [1, 0, 2] : vector<8x2x16xf32> -> vector<2x8x16xf32>
    %157 = arith.truncf %156 : vector<2x8x16xf32> to vector<2x8x16xbf16>
    %158 = vector.extract_strided_slice %153 {offsets = [0, 32], sizes = [8, 32], strides = [1, 1]} : vector<8x96xf32> to vector<8x32xf32>
    %159 = vector.shape_cast %158 : vector<8x32xf32> to vector<8x2x16xf32>
    %160 = tpu.transpose %159, [1, 0, 2] : vector<8x2x16xf32> -> vector<2x8x16xf32>
    %161 = arith.truncf %160 : vector<2x8x16xf32> to vector<2x8x16xbf16>
    %162 = vector.extract_strided_slice %153 {offsets = [0, 64], sizes = [8, 32], strides = [1, 1]} : vector<8x96xf32> to vector<8x32xf32>
    %163 = vector.shape_cast %162 : vector<8x32xf32> to vector<8x2x16xf32>
    %164 = tpu.transpose %163, [1, 0, 2] : vector<8x2x16xf32> -> vector<2x8x16xf32>
    %165 = arith.truncf %164 : vector<2x8x16xf32> to vector<2x8x16xbf16>
    "tpu.trace_start"() <{level = 10 : i32, message = "hqd,hkd->hqk"}> : () -> ()
    %cst_69 = arith.constant dense<0.000000e+00> : vector<2x8x8xf32>
    %166 = tpu.matmul %157, %161, %cst_69 {dimension_numbers = #tpu.dot_dimension_numbers<[2], [2], [1], [1], [0, 0, 0, 1, 1, 1], [0], [0]>} : vector<2x8x16xbf16>, vector<2x8x16xbf16>, vector<2x8x8xf32> -> vector<2x8x8xf32>
    %cst_70 = arith.constant -1.000000e+09 : f32
    "tpu.trace_stop"() : () -> ()
    %167 = vector.shape_cast %11 : vector<1x1x8xi1> to vector<1x1x8xi1>
    %168 = vector.broadcast %167 : vector<1x1x8xi1> to vector<2x8x8xi1>
    %169 = vector.broadcast %cst_70 : f32 to vector<2x8x8xf32>
    %170 = arith.select %168, %169, %166 : vector<2x8x8xi1>, vector<2x8x8xf32>
    %cst_71 = arith.constant dense<0xFF800000> : vector<2x8xf32>
    %171 = vector.multi_reduction <maximumf>, %170, %cst_71 [2] : vector<2x8x8xf32> to vector<2x8xf32>
    %172 = vector.shape_cast %171 : vector<2x8xf32> to vector<2x8x1xf32>
    %173 = vector.broadcast %172 : vector<2x8x1xf32> to vector<2x8x8xf32>
    %174 = arith.subf %170, %173 : vector<2x8x8xf32>
    %175 = math.exp %174 : vector<2x8x8xf32>
    %cst_72 = arith.constant dense<0.000000e+00> : vector<2x8xf32>
    %176 = vector.multi_reduction <add>, %175, %cst_72 [2] : vector<2x8x8xf32> to vector<2x8xf32>
    %177 = vector.shape_cast %176 : vector<2x8xf32> to vector<2x8x1xf32>
    %178 = tpu.reciprocal %177 {approx = true} : vector<2x8x1xf32> -> vector<2x8x1xf32>
    %179 = vector.broadcast %178 : vector<2x8x1xf32> to vector<2x8x8xf32>
    %180 = arith.mulf %175, %179 : vector<2x8x8xf32>
    %181 = arith.truncf %180 : vector<2x8x8xf32> to vector<2x8x8xbf16>
    "tpu.trace_start"() <{level = 10 : i32, message = "hqk,hkd->hqd"}> : () -> ()
    %cst_73 = arith.constant dense<0.000000e+00> : vector<2x8x16xf32>
    %182 = tpu.matmul %181, %165, %cst_73 {dimension_numbers = #tpu.dot_dimension_numbers<[2], [1], [1], [2], [0, 0, 0, 1, 1, 2], [0], [0]>} : vector<2x8x8xbf16>, vector<2x8x16xbf16>, vector<2x8x16xf32> -> vector<2x8x16xf32>
    "tpu.trace_stop"() : () -> ()
    %183 = tpu.transpose %182, [1, 0, 2] : vector<2x8x16xf32> -> vector<8x2x16xf32>
    %184 = vector.shape_cast %183 : vector<8x2x16xf32> to vector<8x32xf32>
    %185 = arith.truncf %184 : vector<8x32xf32> to vector<8x32xbf16>
    %c1_74 = arith.constant 1 : index
    %c0_75 = arith.constant 0 : index
    %c0_76 = arith.constant 0 : index
    %186 = vector.load %arg6[%c1_74, %c0_75, %c0_76] : memref<2x32x32xbf16, #tpu.memory_space<vmem>>, vector<1x32x32xbf16>
    %187 = vector.shape_cast %186 : vector<1x32x32xbf16> to vector<32x32xbf16>
    %cst_77 = arith.constant dense<0.000000e+00> : vector<8x32xf32>
    %188 = tpu.matmul %185, %187, %cst_77 {dimension_numbers = #tpu.dot_dimension_numbers<[1], [0], [0], [1], [0, 0, 1, 1], [], []>} : vector<8x32xbf16>, vector<32x32xbf16>, vector<8x32xf32> -> vector<8x32xf32>
    %c1_78 = arith.constant 1 : index
    %c0_79 = arith.constant 0 : index
    %c0_80 = arith.constant 0 : index
    %189 = vector.load %arg7[%c1_78, %c0_79, %c0_80] : memref<2x1x32xf32, #tpu.memory_space<vmem>>, vector<1x1x32xf32>
    %190 = vector.shape_cast %189 : vector<1x1x32xf32> to vector<1x32xf32>
    %191 = vector.broadcast %190 : vector<1x32xf32> to vector<8x32xf32>
    %192 = arith.addf %188, %191 : vector<8x32xf32>
    %193 = arith.addf %192, %145 : vector<8x32xf32>
    %c1_81 = arith.constant 1 : index
    %c0_82 = arith.constant 0 : index
    %c0_83 = arith.constant 0 : index
    %194 = vector.load %arg8[%c1_81, %c0_82, %c0_83] : memref<2x1x32xf32, #tpu.memory_space<vmem>>, vector<1x1x32xf32>
    %195 = vector.shape_cast %194 : vector<1x1x32xf32> to vector<1x32xf32>
    %c1_84 = arith.constant 1 : index
    %c0_85 = arith.constant 0 : index
    %c0_86 = arith.constant 0 : index
    %196 = vector.load %arg9[%c1_84, %c0_85, %c0_86] : memref<2x1x32xf32, #tpu.memory_space<vmem>>, vector<1x1x32xf32>
    %197 = vector.shape_cast %196 : vector<1x1x32xf32> to vector<1x32xf32>
    %cst_87 = arith.constant dense<0.000000e+00> : vector<8xf32>
    %198 = vector.multi_reduction <add>, %193, %cst_87 [1] : vector<8x32xf32> to vector<8xf32>
    %199 = vector.shape_cast %198 : vector<8xf32> to vector<8x1xf32>
    %cst_88 = arith.constant 3.200000e+01 : f32
    %200 = vector.broadcast %cst_88 : f32 to vector<8x1xf32>
    %201 = arith.divf %199, %200 : vector<8x1xf32>
    %202 = vector.broadcast %201 : vector<8x1xf32> to vector<8x32xf32>
    %203 = arith.subf %193, %202 : vector<8x32xf32>
    %204 = arith.mulf %203, %203 : vector<8x32xf32>
    %cst_89 = arith.constant dense<0.000000e+00> : vector<8xf32>
    %205 = vector.multi_reduction <add>, %204, %cst_89 [1] : vector<8x32xf32> to vector<8xf32>
    %206 = vector.shape_cast %205 : vector<8xf32> to vector<8x1xf32>
    %cst_90 = arith.constant 3.200000e+01 : f32
    %207 = vector.broadcast %cst_90 : f32 to vector<8x1xf32>
    %208 = arith.divf %206, %207 : vector<8x1xf32>
    %209 = vector.broadcast %201 : vector<8x1xf32> to vector<8x32xf32>
    %210 = arith.subf %193, %209 : vector<8x32xf32>
    %cst_91 = arith.constant 9.99999974E-6 : f32
    %211 = vector.broadcast %cst_91 : f32 to vector<8x1xf32>
    %212 = arith.addf %208, %211 : vector<8x1xf32>
    %213 = math.rsqrt %212 : vector<8x1xf32>
    %214 = vector.broadcast %213 : vector<8x1xf32> to vector<8x32xf32>
    %215 = arith.mulf %210, %214 : vector<8x32xf32>
    %216 = vector.broadcast %195 : vector<1x32xf32> to vector<8x32xf32>
    %217 = arith.mulf %215, %216 : vector<8x32xf32>
    %218 = vector.broadcast %197 : vector<1x32xf32> to vector<8x32xf32>
    %219 = arith.addf %217, %218 : vector<8x32xf32>
    %cst_92 = arith.constant 0.000000e+00 : f32
    %220 = vector.shape_cast %8 : vector<8x1xi1> to vector<8x1xi1>
    %221 = vector.broadcast %220 : vector<8x1xi1> to vector<8x32xi1>
    %222 = vector.broadcast %cst_92 : f32 to vector<8x32xf32>
    %223 = arith.select %221, %222, %219 : vector<8x32xi1>, vector<8x32xf32>
    %cst_93 = arith.constant 0.000000e+00 : f32
    %224 = vector.broadcast %cst_93 : f32 to vector<1x32xf32>
    %225 = vector.extract_strided_slice %223 {offsets = [0, 0], sizes = [7, 32], strides = [1, 1]} : vector<8x32xf32> to vector<7x32xf32>
    %226 = tpu.concatenate %224, %225 in 0 : vector<1x32xf32>, vector<7x32xf32> -> vector<8x32xf32>
    %cst_94 = arith.constant 0.000000e+00 : f32
    %227 = vector.broadcast %cst_94 : f32 to vector<1x32xf32>
    %228 = vector.extract_strided_slice %223 {offsets = [1, 0], sizes = [7, 32], strides = [1, 1]} : vector<8x32xf32> to vector<7x32xf32>
    %229 = tpu.concatenate %228, %227 in 0 : vector<7x32xf32>, vector<1x32xf32> -> vector<8x32xf32>
    %230 = tpu.concatenate %226, %223, %229 in 1 : vector<8x32xf32>, vector<8x32xf32>, vector<8x32xf32> -> vector<8x96xf32>
    %231 = arith.truncf %230 : vector<8x96xf32> to vector<8x96xbf16>
    %c1_95 = arith.constant 1 : index
    %c0_96 = arith.constant 0 : index
    %c0_97 = arith.constant 0 : index
    %232 = vector.load %arg10[%c1_95, %c0_96, %c0_97] : memref<2x96x64xbf16, #tpu.memory_space<vmem>>, vector<1x96x64xbf16>
    %233 = vector.shape_cast %232 : vector<1x96x64xbf16> to vector<96x64xbf16>
    %cst_98 = arith.constant dense<0.000000e+00> : vector<8x64xf32>
    %234 = tpu.matmul %231, %233, %cst_98 {dimension_numbers = #tpu.dot_dimension_numbers<[1], [0], [0], [1], [0, 0, 1, 1], [], []>} : vector<8x96xbf16>, vector<96x64xbf16>, vector<8x64xf32> -> vector<8x64xf32>
    %c1_99 = arith.constant 1 : index
    %c0_100 = arith.constant 0 : index
    %c0_101 = arith.constant 0 : index
    %235 = vector.load %arg11[%c1_99, %c0_100, %c0_101] : memref<2x1x64xf32, #tpu.memory_space<vmem>>, vector<1x1x64xf32>
    %236 = vector.shape_cast %235 : vector<1x1x64xf32> to vector<1x64xf32>
    %237 = vector.broadcast %236 : vector<1x64xf32> to vector<8x64xf32>
    %238 = arith.addf %234, %237 : vector<8x64xf32>
    %cst_102 = arith.constant 0.000000e+00 : f32
    %239 = vector.broadcast %cst_102 : f32 to vector<8x64xf32>
    %240 = arith.maximumf %238, %239 : vector<8x64xf32>
    %241 = arith.truncf %240 : vector<8x64xf32> to vector<8x64xbf16>
    %c1_103 = arith.constant 1 : index
    %c0_104 = arith.constant 0 : index
    %c0_105 = arith.constant 0 : index
    %242 = vector.load %arg12[%c1_103, %c0_104, %c0_105] : memref<2x64x32xbf16, #tpu.memory_space<vmem>>, vector<1x64x32xbf16>
    %243 = vector.shape_cast %242 : vector<1x64x32xbf16> to vector<64x32xbf16>
    %cst_106 = arith.constant dense<0.000000e+00> : vector<8x32xf32>
    %244 = tpu.matmul %241, %243, %cst_106 {dimension_numbers = #tpu.dot_dimension_numbers<[1], [0], [0], [1], [0, 0, 1, 1], [], []>} : vector<8x64xbf16>, vector<64x32xbf16>, vector<8x32xf32> -> vector<8x32xf32>
    %c1_107 = arith.constant 1 : index
    %c0_108 = arith.constant 0 : index
    %c0_109 = arith.constant 0 : index
    %245 = vector.load %arg13[%c1_107, %c0_108, %c0_109] : memref<2x1x32xf32, #tpu.memory_space<vmem>>, vector<1x1x32xf32>
    %246 = vector.shape_cast %245 : vector<1x1x32xf32> to vector<1x32xf32>
    %247 = vector.broadcast %246 : vector<1x32xf32> to vector<8x32xf32>
    %248 = arith.addf %244, %247 : vector<8x32xf32>
    %249 = arith.addf %248, %223 : vector<8x32xf32>
    %c1_110 = arith.constant 1 : index
    %c0_111 = arith.constant 0 : index
    %c0_112 = arith.constant 0 : index
    %250 = vector.load %arg14[%c1_110, %c0_111, %c0_112] : memref<2x1x32xf32, #tpu.memory_space<vmem>>, vector<1x1x32xf32>
    %251 = vector.shape_cast %250 : vector<1x1x32xf32> to vector<1x32xf32>
    %c1_113 = arith.constant 1 : index
    %c0_114 = arith.constant 0 : index
    %c0_115 = arith.constant 0 : index
    %252 = vector.load %arg15[%c1_113, %c0_114, %c0_115] : memref<2x1x32xf32, #tpu.memory_space<vmem>>, vector<1x1x32xf32>
    %253 = vector.shape_cast %252 : vector<1x1x32xf32> to vector<1x32xf32>
    %cst_116 = arith.constant dense<0.000000e+00> : vector<8xf32>
    %254 = vector.multi_reduction <add>, %249, %cst_116 [1] : vector<8x32xf32> to vector<8xf32>
    %255 = vector.shape_cast %254 : vector<8xf32> to vector<8x1xf32>
    %cst_117 = arith.constant 3.200000e+01 : f32
    %256 = vector.broadcast %cst_117 : f32 to vector<8x1xf32>
    %257 = arith.divf %255, %256 : vector<8x1xf32>
    %258 = vector.broadcast %257 : vector<8x1xf32> to vector<8x32xf32>
    %259 = arith.subf %249, %258 : vector<8x32xf32>
    %260 = arith.mulf %259, %259 : vector<8x32xf32>
    %cst_118 = arith.constant dense<0.000000e+00> : vector<8xf32>
    %261 = vector.multi_reduction <add>, %260, %cst_118 [1] : vector<8x32xf32> to vector<8xf32>
    %262 = vector.shape_cast %261 : vector<8xf32> to vector<8x1xf32>
    %cst_119 = arith.constant 3.200000e+01 : f32
    %263 = vector.broadcast %cst_119 : f32 to vector<8x1xf32>
    %264 = arith.divf %262, %263 : vector<8x1xf32>
    %265 = vector.broadcast %257 : vector<8x1xf32> to vector<8x32xf32>
    %266 = arith.subf %249, %265 : vector<8x32xf32>
    %cst_120 = arith.constant 9.99999974E-6 : f32
    %267 = vector.broadcast %cst_120 : f32 to vector<8x1xf32>
    %268 = arith.addf %264, %267 : vector<8x1xf32>
    %269 = math.rsqrt %268 : vector<8x1xf32>
    %270 = vector.broadcast %269 : vector<8x1xf32> to vector<8x32xf32>
    %271 = arith.mulf %266, %270 : vector<8x32xf32>
    %272 = vector.broadcast %251 : vector<1x32xf32> to vector<8x32xf32>
    %273 = arith.mulf %271, %272 : vector<8x32xf32>
    %274 = vector.broadcast %253 : vector<1x32xf32> to vector<8x32xf32>
    %275 = arith.addf %273, %274 : vector<8x32xf32>
    %cst_121 = arith.constant 0.000000e+00 : f32
    %276 = vector.shape_cast %8 : vector<8x1xi1> to vector<8x1xi1>
    %277 = vector.broadcast %276 : vector<8x1xi1> to vector<8x32xi1>
    %278 = vector.broadcast %cst_121 : f32 to vector<8x32xf32>
    %279 = arith.select %277, %278, %275 : vector<8x32xi1>, vector<8x32xf32>
    %c0_122 = arith.constant 0 : index
    %c0_123 = arith.constant 0 : index
    %c0_124 = arith.constant 0 : index
    %280 = vector.load %arg16[%c0_122, %c0_123, %c0_124] : memref<1x8x32xf32, #tpu.memory_space<vmem>>, vector<1x8x32xf32>
    %281 = vector.shape_cast %280 : vector<1x8x32xf32> to vector<8x32xf32>
    %282 = vector.shape_cast %279 : vector<8x32xf32> to vector<1x8x32xf32>
    tpu.vector_store %arg16[%c0_122, %c0_123, %c0_124], %282 {strides = array<i32>} : memref<1x8x32xf32, #tpu.memory_space<vmem>>, vector<1x8x32xf32>,
    return
  }
  func.func @transform_0(%arg0: i32, %arg1: memref<2xi32, #tpu.memory_space<smem>>) -> (i32, i32, i32) {
    %c0_i32 = arith.constant 0 : i32
    %c0_i32_0 = arith.constant 0 : i32
    %c0_i32_1 = arith.constant 0 : i32
    return %arg0, %c0_i32, %c0_i32_0 : i32, i32, i32
  }
  func.func @transform_1(%arg0: i32, %arg1: memref<2xi32, #tpu.memory_space<smem>>) -> (i32, i32) {
    %c0_i32 = arith.constant 0 : i32
    %c0_i32_0 = arith.constant 0 : i32
    %c0_i32_1 = arith.constant 0 : i32
    return %c0_i32, %c0_i32_0 : i32, i32
  }
  func.func @transform_2(%arg0: i32, %arg1: memref<2xi32, #tpu.memory_space<smem>>) -> (i32, i32, i32) {
    %c0_i32 = arith.constant 0 : i32
    %c0_i32_0 = arith.constant 0 : i32
    %c0_i32_1 = arith.constant 0 : i32
    %c0_i32_2 = arith.constant 0 : i32
    return %c0_i32, %c0_i32_0, %c0_i32_1 : i32, i32, i32
  }
  func.func @transform_3(%arg0: i32, %arg1: memref<2xi32, #tpu.memory_space<smem>>) -> (i32, i32, i32) {
    %c0_i32 = arith.constant 0 : i32
    %c0_i32_0 = arith.constant 0 : i32
    %c0_i32_1 = arith.constant 0 : i32
    %c0_i32_2 = arith.constant 0 : i32
    return %c0_i32, %c0_i32_0, %c0_i32_1 : i32, i32, i32
  }
  func.func @transform_4(%arg0: i32, %arg1: memref<2xi32, #tpu.memory_space<smem>>) -> (i32, i32, i32) {
    %c0_i32 = arith.constant 0 : i32
    %c0_i32_0 = arith.constant 0 : i32
    %c0_i32_1 = arith.constant 0 : i32
    %c0_i32_2 = arith.constant 0 : i32
    return %c0_i32, %c0_i32_0, %c0_i32_1 : i32, i32, i32
  }
  func.func @transform_5(%arg0: i32, %arg1: memref<2xi32, #tpu.memory_space<smem>>) -> (i32, i32, i32) {
    %c0_i32 = arith.constant 0 : i32
    %c0_i32_0 = arith.constant 0 : i32
    %c0_i32_1 = arith.constant 0 : i32
    %c0_i32_2 = arith.constant 0 : i32
    return %c0_i32, %c0_i32_0, %c0_i32_1 : i32, i32, i32
  }
  func.func @transform_6(%arg0: i32, %arg1: memref<2xi32, #tpu.memory_space<smem>>) -> (i32, i32, i32) {
    %c0_i32 = arith.constant 0 : i32
    %c0_i32_0 = arith.constant 0 : i32
    %c0_i32_1 = arith.constant 0 : i32
    %c0_i32_2 = arith.constant 0 : i32
    return %c0_i32, %c0_i32_0, %c0_i32_1 : i32, i32, i32
  }
  func.func @transform_7(%arg0: i32, %arg1: memref<2xi32, #tpu.memory_space<smem>>) -> (i32, i32, i32) {
    %c0_i32 = arith.constant 0 : i32
    %c0_i32_0 = arith.constant 0 : i32
    %c0_i32_1 = arith.constant 0 : i32
    %c0_i32_2 = arith.constant 0 : i32
    return %c0_i32, %c0_i32_0, %c0_i32_1 : i32, i32, i32
  }
  func.func @transform_8(%arg0: i32, %arg1: memref<2xi32, #tpu.memory_space<smem>>) -> (i32, i32, i32) {
    %c0_i32 = arith.constant 0 : i32
    %c0_i32_0 = arith.constant 0 : i32
    %c0_i32_1 = arith.constant 0 : i32
    %c0_i32_2 = arith.constant 0 : i32
    return %c0_i32, %c0_i32_0, %c0_i32_1 : i32, i32, i32
  }
  func.func @transform_9(%arg0: i32, %arg1: memref<2xi32, #tpu.memory_space<smem>>) -> (i32, i32, i32) {
    %c0_i32 = arith.constant 0 : i32
    %c0_i32_0 = arith.constant 0 : i32
    %c0_i32_1 = arith.constant 0 : i32
    %c0_i32_2 = arith.constant 0 : i32
    return %c0_i32, %c0_i32_0, %c0_i32_1 : i32, i32, i32
  }
  func.func @transform_10(%arg0: i32, %arg1: memref<2xi32, #tpu.memory_space<smem>>) -> (i32, i32, i32) {
    %c0_i32 = arith.constant 0 : i32
    %c0_i32_0 = arith.constant 0 : i32
    %c0_i32_1 = arith.constant 0 : i32
    %c0_i32_2 = arith.constant 0 : i32
    return %c0_i32, %c0_i32_0, %c0_i32_1 : i32, i32, i32
  }
  func.func @transform_11(%arg0: i32, %arg1: memref<2xi32, #tpu.memory_space<smem>>) -> (i32, i32, i32) {
    %c0_i32 = arith.constant 0 : i32
    %c0_i32_0 = arith.constant 0 : i32
    %c0_i32_1 = arith.constant 0 : i32
    %c0_i32_2 = arith.constant 0 : i32
    return %c0_i32, %c0_i32_0, %c0_i32_1 : i32, i32, i32
  }
  func.func @transform_12(%arg0: i32, %arg1: memref<2xi32, #tpu.memory_space<smem>>) -> (i32, i32, i32) {
    %c0_i32 = arith.constant 0 : i32
    %c0_i32_0 = arith.constant 0 : i32
    %c0_i32_1 = arith.constant 0 : i32
    %c0_i32_2 = arith.constant 0 : i32
    return %c0_i32, %c0_i32_0, %c0_i32_1 : i32, i32, i32
  }
  func.func @transform_13(%arg0: i32, %arg1: memref<2xi32, #tpu.memory_space<smem>>) -> (i32, i32, i32) {
    %c0_i32 = arith.constant 0 : i32
    %c0_i32_0 = arith.constant 0 : i32
    %c0_i32_1 = arith.constant 0 : i32
    %c0_i32_2 = arith.constant 0 : i32
    return %c0_i32, %c0_i32_0, %c0_i32_1 : i32, i32, i32
  }
  func.func @transform_14(%arg0: i32, %arg1: memref<2xi32, #tpu.memory_space<smem>>) -> (i32, i32, i32) {
    %c0_i32 = arith.constant 0 : i32
    %c0_i32_0 = arith.constant 0 : i32
    %c0_i32_1 = arith.constant 0 : i32
    return %arg0, %c0_i32, %c0_i32_0 : i32, i32, i32
  }
}

</mosaic_0001>

<bundles_post_ra>
// kernel: decoder_forward.1
= control target key start
LH: loop header
LB: loop body
LE: loop exit
PB: predicated region body
PF: predicated region fallthrough
CT: control target
= control target key end

     0   :  { %s3933_s0 = inlined_call_operand.vmem [shape: s32[2], index: 0, kind: input, shape index: {}]   ;;  %s3934_s1 = inlined_call_operand.vmem [shape: f32[2,8,32], index: 1, kind: input, shape index: {}]   ;;  %s3935_s2 = inlined_call_operand.vmem [shape: f32[8,32], index: 2, kind: input, shape index: {}]   ;;  %s3936_s3 = inlined_call_operand.vmem [shape: bf16[2,32,96], index: 3, kind: input, shape index: {}]   ;;  %s3937_s4 = inlined_call_operand.vmem [shape: f32[2,1,96], index: 4, kind: input, shape index: {}]   ;;  %s3938_s5 = inlined_call_operand.vmem [shape: bf16[2,32,32], index: 5, kind: input, shape index: {}]   ;;  %s3939_s6 = inlined_call_operand.vmem [shape: f32[2,1,32], index: 6, kind: input, shape index: {}]   ;;  %s3940_s7 = inlined_call_operand.vmem [shape: f32[2,1,32], index: 7, kind: input, shape index: {}]   ;;  %s3941_s8 = inlined_call_operand.vmem [shape: f32[2,1,32], index: 8, kind: input, shape index: {}]   ;;  %s3942_s9 = inlined_call_operand.vmem [shape: bf16[2,96,64], index: 9, kind: input, shape index: {}]   ;;  %s3943_s10 = inlined_call_operand.vmem [shape: f32[2,1,64], index: 10, kind: input, shape index: {}]   ;;  %s3944_s11 = inlined_call_operand.vmem [shape: bf16[2,64,32], index: 11, kind: input, shape index: {}]   ;;  %s3945_s12 = inlined_call_operand.vmem [shape: f32[2,1,32], index: 12, kind: input, shape index: {}]   ;;  %s3946_s13 = inlined_call_operand.vmem [shape: f32[2,1,32], index: 13, kind: input, shape index: {}]   ;;  %s3947_s14 = inlined_call_operand.vmem [shape: f32[2,1,32], index: 14, kind: input, shape index: {}]   ;;  %s3948_s15 = inlined_call_operand.hbm [shape: f32[2,8,32], index: 15, kind: output, shape index: {}]  }
   0x1   :  { %3956 = sst [smem:[#allocation8_spill]] %s3934_s1  ;;  %s20_s20 = sshll.u32 %s3933_s0, 4  ;;  %s21_s20 = int_to_ptr.vmem [resolvable:$true] %s20_s20 }
   0x2   :  { %3957 = sst [smem:[#allocation9_spill]] %s3935_s2  ;;  %s3184_s21 = scalar_lea.vmem %s21_s20, 16 }
   0x3   :  { %3958 = sst [smem:[#allocation10_spill]] %s3936_s3  ;;  %p3185_p0 = scmp.ne.s32.totalorder %s21_s20, %s3184_s21 }
   0x4   :  { %3959 = sst [smem:[#allocation11_spill]] %s3937_s4  ;;  %p3189_p1 = scmp.lt.s32.totalorder %s21_s20, %s21_s20 }
   0x5   :  { %3960 = sst [smem:[#allocation12_spill]] %s3938_s5  ;;  %p3190_p2 = scmp.lt.s32.totalorder %s3184_s21, %s3184_s21 }
   0x7   :  { %p3191_p3 = por %p3190_p2, %p3189_p1 }
   0x9   :  { %p3192_p4 = pnand %p3191_p3, %p3185_p0 }
   0xb   :  { %3195 = shalt.err (!%p3192_p4)  }
   0xc   :  { %s3262_s22 = smov [#allocation3]  }
   0xd   :  { %23 = dma.vmem_to_smem %s21_s20, 16, %s3262_s22, [#allocation2] }
   0xe   :  { %3240 = dma.done.wait [#allocation2], 16 }
   0xf   :  { %3241 = vsyncadd [#allocation2], 4294967280 }
  0x10   :  { %25 = sfence }
  0x11   :  { %26 = vsyncpa [#allocation5], 0 }
  0x12   :  { %28 = vsyncpa [#allocation5 + $0x1], 0  ;;  %s3356_s23 = smov 0   ;;  %s3358_s24 = smov 0  }
  0x13   :  { %s3360_s0 = smov 0   ;;  %s3362_s25 = smov 0  }
  0x14 LB: > { %s3377_s26 = sadd.s32 4294967295, %s3260_s25   ;;  %s2773_s27 = sadd.s32 4294967294, %s3260_s25   ;;  %s3260_s25 = sphi %s3362_s25, %s3980_s25   ;;  %s3256_s0 = sphi %s3360_s0, %s3979_s0   ;;  %s3252_s24 = sphi %s3358_s24, %s3978_s24   ;;  %s3248_s23 = sphi %s3356_s23, %s3977_s23  }
  0x15   : > { %s3381_s28 = sadd.s32 1, %s3260_s25   ;;  %s340_s29 = sadd.s32 1, %s3256_s0 }
  0x16   : > { %s337_s30 = ssub.s32 %s3260_s25, %s3381_s28  ;;  %p350_p5 = scmp.ne.s32.totalorder %s3256_s0, %s3252_s24 }
  0x17   : > { %p338_p6 = scmp.eq.s32.totalorder %s337_s30, 0  ;;  %p351_p7 = scmp.eq.s32.totalorder %s3377_s26, 1 }
  0x18   : > { %p356_p8 = scmp.ne.s32.totalorder %s3252_s24, %s3248_s23  ;;  %p357_p9 = scmp.eq.s32.totalorder %s2773_s27, 1 }
  0x19   : > { %s3392_s16 = scalar_select %p338_p6, %s3256_s0, %s340_s29  }
  0x1a   : > { %p3394_p10 = por %p351_p7, %p350_p5  ;;  %p3398_p11 = por %p357_p9, %p356_p8 }
  0x1b   : > { %p2776_p12 = scmp.ge.s32.totalorder %s3260_s25, 1  ;;  %p421_p13 = scmp.lt.s32.totalorder %s3260_s25, 3 }
  0x1d   : > { %p422_p0 = pnand %p2776_p12, %p421_p13 }
  0x1e   : > { %s3963_s3 = sld [smem:[#allocation10_spill]] (!%p422_p0)  ;;  %v3263_v1 = vmov (!%p422_p0), 0.0   ;;  %vm3264_vm0 = vmmov (!%p422_p0), 0   ;;  %p466_p1 = scmp.lt.s32.totalorder (!%p422_p0), %s3377_s26, 1  ;;  %vm506_vm1 = vcmask (!%p422_p0), 261120   ;;  %v475_v14 = vlaneseq (!%p422_p0) }
  0x1f   : > { %425 = sbr.rel (%p422_p0) target bundleno = 5587 (0x15d3), region = 76  ;;  %2947 = vmatprep.subr.bf16.mxu0 (!%p422_p0), %v3263_v1  ;;  %2955 = vmatprep.subr.bf16.mxu1 (!%p422_p0), %v3263_v1  ;;  %s3964_s2 = sld [smem:[#allocation9_spill]] (!%p422_p0)  ;;  %v3267_v15 = vmov (!%p422_p0), 1983009808   ;;  %v3268_v22 = vmov (!%p422_p0), 1934713408  }
  0x20   : > { %2951 = vmatprep.mubr.msk.bf16.mxu0 (!%p422_p0), %vm3264_vm0, %v3263_v1  ;;  %2957 = vmatprep.mubr.msk.bf16.mxu1 (!%p422_p0), %vm3264_vm0, %v3263_v1  ;;  %s3965_s1 = sld [smem:[#allocation8_spill]] (!%p422_p0)  ;;  %s3966_s4 = sld [smem:[#allocation11_spill]] (!%p422_p0)  ;;  %v556_v16 = vunpack.c.l.s4 (!%p422_p0), %v3267_v15  ;;  %v3447_v17 = vshrl.u32 (!%p422_p0), %v475_v14, 7  ;;  %v587_v23 = vunpack.c.l.s4 (!%p422_p0), %v3268_v22  ;;  %vm920_vm2 = vcmask (!%p422_p0), 130048  }
  0x21   : > { %s3951_s19 = smov (!%p422_p0), 96   ;;  %s3502_s20 = sld [smem:[#allocation3 + %s3377_s26]] (!%p422_p0)  ;;  %vm1017_vm4 = vcmask (!%p422_p0), 64512   ;;  %vm1045_vm5 = vcmask (!%p422_p0), 1043456   ;;  %vm1364_vm7 = vcmask (!%p422_p0), 1046528   ;;  %vm1360_vm8 = vcmask (!%p422_p0), 1040384  }
  0x22   : > { %v557_v18 = vunpack.c.0.s8 (!%p422_p0), %v556_v16  ;;  %v588_v25 = vunpack.c.0.s8 (!%p422_p0), %v587_v23  ;;  %s3953_s21 = smov (!%p422_p0), 64   ;;  %s3969_s5 = sld [smem:[#allocation12_spill]] (!%p422_p0)  ;;  %vm1374_vm9 = vcmask (!%p422_p0), 523264   ;;  %vm1432_vm10 = vcmask (!%p422_p0), 785408  }
  0x23   : > { %s463_s30 = sand.u32 (!%p422_p0), 1, %s3252_s24  }
  0x24   : > { %v3132_v0 = vld [vmem:[%s3963_s3] sm:$0xff] (!%p422_p0)   ;;  %v3133_v2 = vld [vmem:[%s3963_s3 + $0x8] sm:$0xff] (!%p422_p0)   ;;  %v3454_v21 = vsub.s32 (!%p422_p0), %v557_v18, %v3447_v17  ;;  %v3464_v33 = vsub.s32 (!%p422_p0), %v588_v25, %v3447_v17 }
  0x25   : > { %2948 = vmatpush3.bf16.msra.mxu0 (!%p422_p0), %v3132_v0  ;;  %v473_v3 = vld [vmem:[%s3964_s2] sm:$0xff] (!%p422_p0)  ;;  %s3955_s2 = smov (!%p422_p0), 32  }
  0x26   : > { %2949 = vmatprep.subr.bf16.mxu0 %v3263_v1  ;;  %s467_s27 = scalar_select %p466_p1, %s3377_s26, 1  ;;  %v2779_v7 = vld [vmem:[%s3966_s4] ss:$0 sm:$0xff] }
  0x28   : > { %s2778_s29 = sshll.u32 %s467_s27, 3  ;;  %s3949_s27 = smov 16  }
  0x29   : > { %2950 = vmatpush3.bf16.msra.mxu0 %v3133_v2  ;;  %s469_s22 = scalar_lea.vmem %s3965_s1, %s2778_s29  ;;  %s3950_s29 = smov 112  }
  0x2a   : > { %2961 = vmatprep.subr.bf16.mxu0 %v3263_v1  ;;  %v472_v4 = vld [vmem:[%s469_s22] sm:$0xff]  ;;  %s3976_s22 = smov 32  }
  0x2b   : > { %v3426_v5 = vadd.f32 %v473_v3, %v472_v4 }
  0x2d   : > { %v482_v6 = vpack.c.bf16 %v3426_v5, %v3426_v5 }
  0x2f   : > { %2952 = vmatmul.mubr.msk.bf16.vlgmr.msra.gmra.mrb[0].mxu0 %vm506_vm1, %v482_v6 }
  0x30   : > { %2963 = vmatprep.mubr.msk.bf16.mxu0 %vm3264_vm0, %v3263_v1 }
 0x102   : > { %v544_v8 = vpop.f32.mrb[0].mxu0 }
 0x103   : > { %v3436_v9 = vadd.f32 %v2779_v7, %v544_v8  ;;  %v2953_v10 = vpop.f32.mrb[1].mxu0 }
 0x104   : > { %v547_v11 = vpop.f32.mrb[2].mxu0 }
 0x105   : > { %551 = vrot.lane.b32.xlu0 %v3436_v9, %s3950_s29  ;;  %v2954_v12 = vpop.f32.mrb[3].mxu0  ;;  %v554_v20 = vcombine.high %v3436_v9, %v3263_v1  ;;  %v561_v29 = vrot.slane %v3436_v9, %v3454_v21  ;;  %s3973_s29 = smov 96  }
 0x107   : > { %v568_v26 = vrot.slane %v554_v20, %v3454_v21 }
 0x109   : > { %672 = vrot.lane.b32.xlu0 %v3436_v9, %s3951_s19 }
 0x177   : > { %v3442_v13 = vpop.permute.xlu0 %551 }
 0x178   : > { %674 = vrot.lane.b32.xlu1 %v3442_v13, %s3951_s19  ;;  %v569_v19 = vcombine.high %v3442_v13, %v3263_v1  ;;  %v576_v27 = vrot.slane %v3442_v13, %v3454_v21  ;;  %s3974_s19 = smov 112  }
 0x17a   : > { %v583_v24 = vrot.slane %v569_v19, %v3454_v21  ;;  %v584_v34 = vcombine.low %v561_v29, %v576_v27  ;;  %v585_v35 = vcombine.high %v561_v29, %v576_v27 }
 0x17b   : > { %v673_v28 = vpop.permute.xlu0 %672 }
 0x17c   : > { %v600_v30 = vcombine.low %v568_v26, %v583_v24  ;;  %v601_v31 = vcombine.high %v568_v26, %v583_v24  ;;  %v678_v32 = vcombine.high %v673_v28, %v3263_v1  ;;  %v685_v37 = vrot.slane %v673_v28, %v3454_v21 }
 0x17d   : > { %v592_v46 = vrot.slane %v584_v34, %v3464_v33  ;;  %v599_v47 = vrot.slane %v585_v35, %v3464_v33 }
 0x17e   : > { %v608_v40 = vrot.slane %v600_v30, %v3464_v33  ;;  %v615_v41 = vrot.slane %v601_v31, %v3464_v33  ;;  %v692_v42 = vrot.slane %v678_v32, %v3454_v21  ;;  %v480_v31 = vand.u32 127, %v475_v14 }
 0x17f   : > { %v620_v58 = vcombine.low %v592_v46, %v599_v47  ;;  %v2783_v59 = vcombine.high %v592_v46, %v599_v47  ;;  %v477_v32 = vstv %s3502_s20  ;;  %s3972_s20 = smov 64  }
 0x180   : > { %v636_v52 = vcombine.low %v608_v40, %v615_v41  ;;  %v2784_v53 = vcombine.high %v608_v40, %v615_v41  ;;  %vm3508_vm3 = vcmp.ge.s32.totalorder %v480_v31, %v477_v32  ;;  %vm3624_vm6 = vcmp.ge.s32.totalorder %v3447_v17, %v477_v32 }
 0x181   : > { %v627_v7 = vrot.slane %v620_v58, %v3454_v21  ;;  %v635_v8 = vrot.slane %v2783_v59, %v3454_v21 }
 0x182   : > { %v643_v0 = vrot.slane %v636_v52, %v3454_v21  ;;  %v651_v6 = vrot.slane %v2784_v53, %v3454_v21 }
 0x183   : > { %v652_v19 = vcombine.low %v627_v7, %v635_v8 }
 0x184   : > { %v660_v15 = vcombine.low %v643_v0, %v651_v6 }
 0x185   : > { %v659_v26 = vrot.slane %v652_v19, %v3464_v33 }
 0x186   : > { %v667_v23 = vrot.slane %v660_v15, %v3464_v33 }
 0x188   : > { %v668_v27 = vcombine.low %v659_v26, %v667_v23  ;;  %v669_v28 = vcombine.high %v659_v26, %v667_v23 }
 0x18a   : > { %v670_v29 = vpack.c.bf16 %v668_v27, %v668_v27  ;;  %v671_v30 = vpack.c.bf16 %v669_v28, %v669_v28 }
 0x1ea   : > { %v675_v36 = vpop.permute.xlu1 %674 }
 0x1eb   : > { %v693_v38 = vcombine.high %v675_v36, %v3263_v1  ;;  %v700_v39 = vrot.slane %v675_v36, %v3454_v21 }
 0x1ed   : > { %v707_v43 = vrot.slane %v693_v38, %v3454_v21  ;;  %v708_v44 = vcombine.low %v685_v37, %v700_v39  ;;  %v709_v45 = vcombine.high %v685_v37, %v700_v39 }
 0x1ef   : > { %v716_v48 = vrot.slane %v708_v44, %v3464_v33  ;;  %v723_v49 = vrot.slane %v709_v45, %v3464_v33  ;;  %v724_v50 = vcombine.low %v692_v42, %v707_v43  ;;  %v725_v51 = vcombine.high %v692_v42, %v707_v43 }
 0x1f1   : > { %v732_v54 = vrot.slane %v724_v50, %v3464_v33  ;;  %v739_v55 = vrot.slane %v725_v51, %v3464_v33  ;;  %v744_v56 = vcombine.low %v716_v48, %v723_v49  ;;  %v2785_v57 = vcombine.high %v716_v48, %v723_v49 }
 0x1f3   : > { %v760_v60 = vcombine.low %v732_v54, %v739_v55  ;;  %v2786_v61 = vcombine.high %v732_v54, %v739_v55  ;;  %v751_v62 = vrot.slane %v744_v56, %v3454_v21  ;;  %v759_v63 = vrot.slane %v2785_v57, %v3454_v21 }
 0x1f5   : > { %v767_v2 = vrot.slane %v760_v60, %v3454_v21  ;;  %v775_v3 = vrot.slane %v2786_v61, %v3454_v21  ;;  %v776_v4 = vcombine.low %v751_v62, %v759_v63 }
 0x1f7   : > { %v784_v10 = vcombine.low %v767_v2, %v775_v3  ;;  %v783_v11 = vrot.slane %v776_v4, %v3464_v33 }
 0x1f9   : > { %v791_v12 = vrot.slane %v784_v10, %v3464_v33 }
 0x1fb   : > { %v792_v16 = vcombine.low %v783_v11, %v791_v12  ;;  %v793_v18 = vcombine.high %v783_v11, %v791_v12 }
 0x1fd   : > { %v794_v20 = vpack.c.bf16 %v792_v16, %v792_v16  ;;  %v795_v22 = vpack.c.bf16 %v793_v18, %v793_v18 }
 0x1ff   : > { %v925_v24 = vsel %vm920_vm2, %v794_v20, 0  ;;  %v971_v25 = vsel %vm920_vm2, %v795_v22, 0 }
 0x200   : > { %2956 = vmatpush3.bf16.xpose.msra.mxu1 %v925_v24  ;;  %2962 = vmatpush3.bf16.xpose.msra.mxu0 %v971_v25 }
 0x201   : > { %2967 = vmatprep.subr.bf16.mxu1 %v3263_v1  ;;  %2973 = vmatprep.subr.bf16.mxu0 %v3263_v1 }
 0x207   : > { %2958 = vmatmul.mubr.msk.bf16.vlgmr.msra.gmra.mrb[0].mxu1 %vm920_vm2, %v670_v29  ;;  %2964 = vmatmul.mubr.msk.bf16.vlgmr.msra.gmra.mrb[4].mxu0 %vm920_vm2, %v671_v30 }
 0x208   : > { %2969 = vmatprep.mubr.msk.bf16.mxu1 %vm3264_vm0, %v3263_v1  ;;  %2975 = vmatprep.mubr.msk.bf16.mxu0 %vm3264_vm0, %v3263_v1 }
 0x2da   : > { %v961_v35 = vpop.f32.mrb[0].mxu1  ;;  %v1007_v36 = vpop.f32.mrb[4].mxu0 }
 0x2db   : > { %v1015_v37 = vsel %vm3508_vm3, -1e+09, %v961_v35  ;;  %v1016_v38 = vsel %vm3508_vm3, -1e+09, %v1007_v36  ;;  %v2959_v39 = vpop.f32.mrb[1].mxu1  ;;  %v2965_v40 = vpop.f32.mrb[5].mxu0 }
 0x2dc   : > { %v964_v41 = vpop.f32.mrb[2].mxu1  ;;  %v1010_v42 = vpop.f32.mrb[6].mxu0  ;;  %v1018_v14 = vsel %vm1017_vm4, %v1015_v37, -inf  ;;  %v1021_v43 = vsel %vm1017_vm4, %v1016_v38, -inf }
 0x2dd   : > { %1019 = vmax.xlane.f32.xlu1 %v1018_v14  ;;  %v2960_v44 = vpop.f32.mrb[3].mxu1  ;;  %1022 = vmax.xlane.f32.xlu0 %v1021_v43  ;;  %v2966_v45 = vpop.f32.mrb[7].mxu0  ;;  %v3134_v42 = vld [vmem:[%s3969_s5] sm:$0xff]  }
 0x36a   : > { %v1020_v46 = vpop.xlane.xlu1 %1019  ;;  %v1023_v47 = vpop.xlane.xlu0 %1022 }
 0x36b   : > { %v1024_v48 = vsub.f32 %v1015_v37, %v1020_v46  ;;  %v1025_v49 = vsub.f32 %v1016_v38, %v1023_v47 }
 0x36d   : > { %v1026_v50 = vmul.f32 1.442695, %v1024_v48  ;;  %v1028_v51 = vmul.f32 1.442695, %v1025_v49 }
 0x36f   : > { %3160 = vpow2.f32 %v1026_v50 }
 0x370   : > { %3162 = vpow2.f32 %v1028_v51 }
 0x379   : > { %v3161_v52 = vpop.eup %3160 }
 0x37a   : > { %v3163_v53 = vpop.eup %3162  ;;  %v1030_v54 = vsel %vm1017_vm4, %v3161_v52, 0.0 }
 0x37b   : > { %1031 = vadd.xlane.f32.xlu0 %v1030_v54  ;;  %v1033_v55 = vsel %vm1017_vm4, %v3163_v53, 0.0 }
 0x37c   : > { %1034 = vadd.xlane.f32.xlu1 %v1033_v55 }
 0x38d   : > { %798 = vrot.lane.b32.xlu1 %v3442_v13, %s3953_s21 }
 0x391   : > { %796 = vrot.lane.b32.xlu0 %v3436_v9, %s3953_s21 }
 0x408   : > { %v1032_v56 = vpop.xlane.xlu0 %1031 }
 0x409   : > { %v1035_v57 = vpop.xlane.xlu1 %1034  ;;  %3164 = vrcp.f32 %v1032_v56 }
 0x40a   : > { %3166 = vrcp.f32 %v1035_v57 }
 0x40c   : > { %v797_v58 = vpop.permute.xlu0 %796 }
 0x40d   : > { %v799_v59 = vpop.permute.xlu1 %798  ;;  %v802_v60 = vcombine.high %v797_v58, %v3263_v1  ;;  %v809_v61 = vrot.slane %v797_v58, %v3454_v21 }
 0x40e   : > { %v817_v62 = vcombine.high %v799_v59, %v3263_v1  ;;  %v824_v63 = vrot.slane %v799_v59, %v3454_v21 }
 0x40f   : > { %v816_v0 = vrot.slane %v802_v60, %v3454_v21 }
 0x410   : > { %v831_v2 = vrot.slane %v817_v62, %v3454_v21  ;;  %v832_v13 = vcombine.low %v809_v61, %v824_v63  ;;  %v833_v3 = vcombine.high %v809_v61, %v824_v63  ;;  %v3135_v62 = vld [vmem:[%s3969_s5 + $0x8] sm:$0xff]  }
 0x412   : > { %v840_v9 = vrot.slane %v832_v13, %v3464_v33  ;;  %v847_v4 = vrot.slane %v833_v3, %v3464_v33  ;;  %v848_v6 = vcombine.low %v816_v0, %v831_v2  ;;  %v849_v7 = vcombine.high %v816_v0, %v831_v2 }
 0x413   : > { %v3165_v25 = vpop.eup %3164 }
 0x414   : > { %v856_v8 = vrot.slane %v848_v6, %v3464_v33  ;;  %v863_v10 = vrot.slane %v849_v7, %v3464_v33  ;;  %v868_v11 = vcombine.low %v840_v9, %v847_v4  ;;  %v2787_v12 = vcombine.high %v840_v9, %v847_v4  ;;  %v3167_v28 = vpop.eup %3166 }
 0x415   : > { %v1039_v31 = vmul.f32 %v3167_v28, %v3163_v53  ;;  %v1038_v35 = vmul.f32 %v3165_v25, %v3161_v52 }
 0x416   : > { %v875_v15 = vrot.slane %v868_v11, %v3454_v21  ;;  %v884_v16 = vcombine.low %v856_v8, %v863_v10  ;;  %v2788_v18 = vcombine.high %v856_v8, %v863_v10  ;;  %v883_v19 = vrot.slane %v2787_v12, %v3454_v21 }
 0x417   : > { %v1040_v40 = vpack.c.bf16 %v1038_v35, %v1038_v35  ;;  %v1041_v41 = vpack.c.bf16 %v1039_v31, %v1039_v31 }
 0x418   : > { %v891_v20 = vrot.slane %v884_v16, %v3454_v21  ;;  %v899_v22 = vrot.slane %v2788_v18, %v3454_v21  ;;  %v900_v23 = vcombine.low %v875_v15, %v883_v19 }
 0x41a   : > { %v908_v24 = vcombine.low %v891_v20, %v899_v22  ;;  %v907_v26 = vrot.slane %v900_v23, %v3464_v33  ;;  %v2795_v23 = vld [vmem:[%s3939_s6] ss:$0 sm:$0xff] }
 0x41c   : > { %v915_v27 = vrot.slane %v908_v24, %v3464_v33 }
 0x41e   : > { %v916_v29 = vcombine.low %v907_v26, %v915_v27  ;;  %v917_v30 = vcombine.high %v907_v26, %v915_v27 }
 0x420   : > { %v918_v36 = vpack.c.bf16 %v916_v29, %v916_v29  ;;  %v919_v37 = vpack.c.bf16 %v917_v30, %v917_v30 }
 0x422   : > { %v1047_v38 = vsel %vm1045_vm5, %v918_v36, 0  ;;  %v1093_v39 = vsel %vm1045_vm5, %v919_v37, 0 }
 0x423   : > { %2968 = vmatpush3.bf16.msra.mxu1 %v1047_v38  ;;  %2974 = vmatpush3.bf16.msra.mxu0 %v1093_v39  ;;  %v3136_v39 = vld [vmem:[%s3942_s9] sm:$0xff]  }
 0x424   : > { %2979 = vmatprep.subr.bf16.mxu1 %v3263_v1  ;;  %2987 = vmatprep.subr.bf16.mxu0 %v3263_v1 }
 0x426   : > { %2970 = vmatmul.mubr.msk.bf16.vlgmr.msra.gmra.mrb[4].mxu1 %vm1017_vm4, %v1040_v40  ;;  %2976 = vmatmul.mubr.msk.bf16.vlgmr.msra.gmra.mrb[8].mxu0 %vm1017_vm4, %v1041_v41  ;;  %v3137_v40 = vld [vmem:[%s3942_s9 + $0x8] sm:$0xff]   ;;  %v3139_v41 = vld [vmem:[%s3942_s9 + $0x18] sm:$0xff]  }
 0x427   : > { %2983 = vmatprep.mubr.msk.bf16.mxu1 %vm3264_vm0, %v3263_v1  ;;  %2999 = vmatprep.mubr.msk.bf16.mxu0 %vm3264_vm0, %v3263_v1 }
 0x428   : > { %2980 = vmatpush3.bf16.msra.mxu1 %v3134_v42  ;;  %2988 = vmatpush3.bf16.msra.mxu0 %v3136_v39  ;;  %v3140_v42 = vld [vmem:[%s3942_s9 + $0x20] sm:$0xff]  }
 0x429   : > { %2981 = vmatprep.subr.bf16.mxu1 %v3263_v1  ;;  %2989 = vmatprep.subr.bf16.mxu0 %v3263_v1 }
 0x42c   : > { %2982 = vmatpush3.bf16.msra.mxu1 %v3135_v62  ;;  %2990 = vmatpush3.bf16.msra.mxu0 %v3137_v40 }
 0x42d   : > { %3003 = vmatprep.subr.bf16.mxu1 %v3263_v1  ;;  %2991 = vmatprep.subr.bf16.mxu0 %v3263_v1 }
 0x4f9   : > { %v1083_v14 = vpop.f32.mrb[4].mxu1  ;;  %v1129_v43 = vpop.f32.mrb[8].mxu0 }
 0x4fa   : > { %v1135_v44 = vcombine.high %v1083_v14, %v3263_v1  ;;  %v1142_v45 = vrot.slane %v1083_v14, %v3454_v21  ;;  %v1150_v46 = vcombine.high %v1129_v43, %v3263_v1  ;;  %v1157_v47 = vrot.slane %v1129_v43, %v3454_v21  ;;  %v2971_v48 = vpop.f32.mrb[5].mxu1  ;;  %v2977_v49 = vpop.f32.mrb[9].mxu0 }
 0x4fb   : > { %v1086_v50 = vpop.f32.mrb[6].mxu1  ;;  %v1132_v51 = vpop.f32.mrb[10].mxu0  ;;  %v3142_v49 = vld [vmem:[%s3944_s11] sm:$0xff]  }
 0x4fc   : > { %v1149_v52 = vrot.slane %v1135_v44, %v3454_v21  ;;  %v1164_v53 = vrot.slane %v1150_v46, %v3454_v21  ;;  %v1165_v54 = vcombine.low %v1142_v45, %v1157_v47  ;;  %v1166_v55 = vcombine.high %v1142_v45, %v1157_v47  ;;  %v2972_v56 = vpop.f32.mrb[7].mxu1  ;;  %v2978_v57 = vpop.f32.mrb[11].mxu0  ;;  %v3141_v45 = vld [vmem:[%s3942_s9 + $0x28] sm:$0xff]   ;;  %v2799_v47 = vld [vmem:[%s3940_s7] ss:$0 sm:$0xff] }
 0x4fd   : > { %v2800_v50 = vld [vmem:[%s3941_s8] ss:$0 sm:$0xff] }
 0x4fe   : > { %v1173_v58 = vrot.slane %v1165_v54, %v3464_v33  ;;  %v1180_v59 = vrot.slane %v1166_v55, %v3464_v33  ;;  %v1181_v60 = vcombine.low %v1149_v52, %v1164_v53  ;;  %v1182_v61 = vcombine.high %v1149_v52, %v1164_v53  ;;  %v3143_v52 = vld [vmem:[%s3944_s11 + $0x8] sm:$0xff]  }
 0x500   : > { %v1189_v63 = vrot.slane %v1181_v60, %v3464_v33  ;;  %v1196_v0 = vrot.slane %v1182_v61, %v3464_v33  ;;  %v1201_v2 = vcombine.low %v1173_v58, %v1180_v59  ;;  %v2793_v13 = vcombine.high %v1173_v58, %v1180_v59 }
 0x502   : > { %v1208_v3 = vrot.slane %v1201_v2, %v3454_v21  ;;  %v1216_v9 = vrot.slane %v2793_v13, %v3454_v21  ;;  %v1217_v4 = vcombine.low %v1189_v63, %v1196_v0  ;;  %v2794_v6 = vcombine.high %v1189_v63, %v1196_v0  ;;  %v3144_v63 = vld [vmem:[%s3944_s11 + $0x10] sm:$0xff]   ;;  %v3145_v0 = vld [vmem:[%s3944_s11 + $0x18] sm:$0xff]   ;;  %v2801_v2 = vld [vmem:[%s3943_s10] ss:$0 sm:$0xff] }
 0x504   : > { %v1224_v7 = vrot.slane %v1217_v4, %v3454_v21  ;;  %v1232_v8 = vrot.slane %v2794_v6, %v3454_v21  ;;  %v1233_v10 = vcombine.low %v1208_v3, %v1216_v9 }
 0x506   : > { %v1241_v11 = vcombine.low %v1224_v7, %v1232_v8  ;;  %v1240_v12 = vrot.slane %v1233_v10, %v3464_v33  ;;  %v2809_v10 = vld [vmem:[%s3945_s12] ss:$0 sm:$0xff] }
 0x508   : > { %v1248_v15 = vrot.slane %v1241_v11, %v3464_v33 }
 0x50a   : > { %v1250_v16 = vcombine.high %v1240_v12, %v1248_v15  ;;  %v1249_v18 = vcombine.low %v1240_v12, %v1248_v15 }
 0x50c   : > { %1252 = vrot.lane.b32.xlu1 %v1250_v16, %s3949_s27  ;;  %s3975_s27 = smov 16  }
 0x57e   : > { %v1253_v19 = vpop.permute.xlu1 %1252 }
 0x57f   : > { %v1255_v20 = vsel %vm920_vm2, %v1249_v18, %v1253_v19 }
 0x580   : > { %v1256_v22 = vpack.c.bf16 %v1255_v20, %v1255_v20 }
 0x582   : > { %2984 = vmatmul.mubr.msk.bf16.vlgmr.msra.gmra.mrb[8].mxu1 %vm506_vm1, %v1256_v22 }
 0x583   : > { %3011 = vmatprep.mubr.msk.bf16.mxu1 %vm3264_vm0, %v3263_v1  ;;  %3004 = vmatpush3.bf16.msra.mxu1 %v3142_v49 }
 0x584   : > { %3005 = vmatprep.subr.bf16.mxu1 %v3263_v1 }
 0x587   : > { %3006 = vmatpush3.bf16.msra.mxu1 %v3143_v52 }
 0x588   : > { %3007 = vmatprep.subr.bf16.mxu1 %v3263_v1 }
 0x58b   : > { %3008 = vmatpush3.bf16.msra.mxu1 %v3144_v63 }
 0x58c   : > { %3009 = vmatprep.subr.bf16.mxu1 %v3263_v1 }
 0x58f   : > { %3010 = vmatpush3.bf16.msra.mxu1 %v3145_v0 }
 0x590   : > { %3015 = vmatprep.subr.bf16.mxu1 %v3263_v1 }
 0x655   : > { %v1317_v24 = vpop.f32.mrb[8].mxu1 }
 0x656   : > { %v1318_v25 = vadd.f32 %v2795_v23, %v1317_v24  ;;  %v2985_v26 = vpop.f32.mrb[9].mxu1 }
 0x657   : > { %v1320_v27 = vpop.f32.mrb[10].mxu1 }
 0x658   : > { %v2986_v28 = vpop.f32.mrb[11].mxu1  ;;  %v1323_v29 = vadd.f32 %v1318_v25, %v3426_v5  ;;  %v3138_v5 = vld [vmem:[%s3942_s9 + $0x10] sm:$0xff]  }
 0x659   : > { %2992 = vmatpush3.bf16.msra.mxu0 %v3138_v5  ;;  %v3146_v27 = vld [vmem:[%s3963_s3 + $0x10] sm:$0xff]   ;;  %v3147_v28 = vld [vmem:[%s3963_s3 + $0x18] sm:$0xff]   ;;  %s2701_s3 = scalar_lea.sflag [#allocation5], %s463_s30 }
 0x65a   : > { %v1326_v30 = vsel %vm506_vm1, %v1323_v29, 0.0  ;;  %2993 = vmatprep.subr.bf16.mxu0 %v3263_v1 }
 0x65b   : > { %1327 = vadd.xlane.f32.xlu0 %v1326_v30 }
 0x65d   : > { %2994 = vmatpush3.bf16.msra.mxu0 %v3139_v41 }
 0x65e   : > { %2995 = vmatprep.subr.bf16.mxu0 %v3263_v1 }
 0x661   : > { %2996 = vmatpush3.bf16.msra.mxu0 %v3140_v42  ;;  %v2822_v42 = vld [vmem:[%s3966_s4 + $0x1] ss:$0 sm:$0xff] }
 0x662   : > { %2997 = vmatprep.subr.bf16.mxu0 %v3263_v1 }
 0x665   : > { %2998 = vmatpush3.bf16.msra.mxu0 %v3141_v45 }
 0x666   : > { %3023 = vmatprep.subr.bf16.mxu0 %v3263_v1 }
 0x6e8   : > { %v1328_v31 = vpop.xlane.xlu0 %1327 }
 0x6e9   : > { %v1330_v35 = vmul.f32 0.03125, %v1328_v31 }
 0x6eb   : > { %v1331_v36 = vsub.f32 %v1323_v29, %v1330_v35 }
 0x6ed   : > { %v1332_v37 = vmul.f32 %v1331_v36, %v1331_v36 }
 0x6ef   : > { %v1333_v38 = vsel %vm506_vm1, %v1332_v37, 0.0 }
 0x6f0   : > { %1334 = vadd.xlane.f32.xlu1 %v1333_v38  ;;  %v2816_v38 = vld [vmem:[%s3947_s14] ss:$0 sm:$0xff] }
 0x77d   : > { %v1335_v14 = vpop.xlane.xlu1 %1334 }
 0x77e   : > { %v1336_v43 = vmul.f32 0.03125, %v1335_v14 }
 0x780   : > { %v1337_v44 = vadd.f32 1e-05, %v1336_v43 }
 0x782   : > { %3168 = vrsqrt.f32 %v1337_v44 }
 0x78c   : > { %v3169_v46 = vpop.eup %3168 }
 0x78d   : > { %v1339_v48 = vmul.f32 %v3169_v46, %v1331_v36  ;;  %v2815_v36 = vld [vmem:[%s3946_s13] ss:$0 sm:$0xff] }
 0x78f   : > { %v1346_v51 = vmul.f32 %v2799_v47, %v1339_v48 }
 0x791   : > { %v1353_v54 = vadd.f32 %v2800_v50, %v1346_v51 }
 0x793   : > { %v1356_v55 = vsel %vm3624_vm6, 0.0, %v1353_v54 }
 0x794   : > { %1366 = vrot.lane.b32.xlu0 %v1356_v55, %s3955_s2  ;;  %v1362_v56 = vrot.slane %v1356_v55, 1  ;;  %v1358_v17 = vrot.slane %v1356_v55, 7 }
 0x796   : > { %v1365_v57 = vsel %vm1364_vm7, %v1362_v56, 0.0  ;;  %v1361_v58 = vsel %vm1360_vm8, 0.0, %v1358_v17 }
 0x797   : > { %1370 = vrot.lane.b32.xlu1 %v1365_v57, %s3972_s20 }
 0x806   : > { %v1367_v32 = vpop.permute.xlu0 %1366 }
 0x807   : > { %v1373_v59 = vsel %vm506_vm1, %v1361_v58, %v1367_v32 }
 0x809   : > { %v1371_v60 = vpop.permute.xlu1 %1370 }
 0x80a   : > { %v1375_v61 = vsel %vm1374_vm9, %v1373_v59, %v1371_v60 }
 0x80b   : > { %v1376_v62 = vpack.c.bf16 %v1375_v61, %v1375_v61 }
 0x80d   : > { %3000 = vmatmul.mubr.msk.bf16.vlgmr.msra.gmra.mrb[12].mxu0 %vm1432_vm10, %v1376_v62 }
 0x80e   : > { %3025 = vmatprep.mubr.msk.bf16.mxu0 %vm3264_vm0, %v3263_v1 }
 0x8e0   : > { %v1470_v13 = vpop.f32.mrb[12].mxu0 }
 0x8e1   : > { %v1471_v3 = vadd.f32 %v2801_v2, %v1470_v13  ;;  %v3001_v9 = vpop.f32.mrb[13].mxu0 }
 0x8e2   : > { %v1473_v4 = vpop.f32.mrb[14].mxu0 }
 0x8e3   : > { %v1476_v6 = vmax.f32 %v1471_v3, 0.0  ;;  %v3002_v7 = vpop.f32.mrb[15].mxu0 }
 0x8e5   : > { %v1477_v8 = vpack.c.bf16 %v1476_v6, %v1476_v6 }
 0x8e7   : > { %3012 = vmatmul.mubr.msk.bf16.vlgmr.msra.gmra.mrb[12].mxu1 %vm1374_vm9, %v1477_v8 }
 0x8e8   : > { %3019 = vmatprep.mubr.msk.bf16.mxu1 %vm3264_vm0, %v3263_v1  ;;  %3016 = vmatpush3.bf16.msra.mxu1 %v3146_v27 }
 0x8e9   : > { %3017 = vmatprep.subr.bf16.mxu1 %v3263_v1 }
 0x8ec   : > { %3018 = vmatpush3.bf16.msra.mxu1 %v3147_v28 }
 0x8ed   : > { %3029 = vmatprep.subr.bf16.mxu1 %v3263_v1 }
 0x9ba   : > { %v1554_v11 = vpop.f32.mrb[12].mxu1 }
 0x9bb   : > { %v1555_v12 = vadd.f32 %v2809_v10, %v1554_v11  ;;  %v3013_v15 = vpop.f32.mrb[13].mxu1 }
 0x9bc   : > { %v1557_v16 = vpop.f32.mrb[14].mxu1 }
 0x9bd   : > { %v3014_v18 = vpop.f32.mrb[15].mxu1  ;;  %v1560_v19 = vadd.f32 %v1555_v12, %v1356_v55 }
 0x9bf   : > { %v1563_v20 = vsel %vm506_vm1, %v1560_v19, 0.0 }
 0x9c0   : > { %1564 = vadd.xlane.f32.xlu0 %v1563_v20 }
 0xa4d   : > { %v1565_v22 = vpop.xlane.xlu0 %1564 }
 0xa4e   : > { %v1566_v23 = vmul.f32 0.03125, %v1565_v22 }
 0xa50   : > { %v1567_v24 = vsub.f32 %v1560_v19, %v1566_v23 }
 0xa52   : > { %v1568_v25 = vmul.f32 %v1567_v24, %v1567_v24 }
 0xa54   : > { %v1569_v26 = vsel %vm506_vm1, %v1568_v25, 0.0 }
 0xa55   : > { %1570 = vadd.xlane.f32.xlu1 %v1569_v26 }
 0xae2   : > { %v1571_v29 = vpop.xlane.xlu1 %1570 }
 0xae3   : > { %v1572_v30 = vmul.f32 0.03125, %v1571_v29 }
 0xae5   : > { %v1573_v31 = vadd.f32 1e-05, %v1572_v30 }
 0xae7   : > { %3170 = vrsqrt.f32 %v1573_v31 }
 0xaf1   : > { %v3171_v35 = vpop.eup %3170 }
 0xaf2   : > { %v1575_v37 = vmul.f32 %v3171_v35, %v1567_v24 }
 0xaf4   : > { %v1582_v39 = vmul.f32 %v2815_v36, %v1575_v37 }
 0xaf6   : > { %v1589_v40 = vadd.f32 %v2816_v38, %v1582_v39 }
 0xaf8   : > { %v3676_v5 = vsel %vm3624_vm6, 0.0, %v1589_v40 }
 0xaf9   : > { %v1591_v41 = vpack.c.bf16 %v3676_v5, %v3676_v5 }
 0xafb   : > { %3020 = vmatmul.mubr.msk.bf16.vlgmr.msra.gmra.mrb[16].mxu1 %vm506_vm1, %v1591_v41 }
 0xafc   : > { %3031 = vmatprep.mubr.msk.bf16.mxu1 %vm3264_vm0, %v3263_v1 }
 0xbce   : > { %v1654_v14 = vpop.f32.mrb[16].mxu1 }
 0xbcf   : > { %v3686_v43 = vadd.f32 %v2822_v42, %v1654_v14  ;;  %v3021_v44 = vpop.f32.mrb[17].mxu1 }
 0xbd0   : > { %v1657_v45 = vpop.f32.mrb[18].mxu1 }
 0xbd1   : > { %1782 = vrot.lane.b32.xlu1 %v3686_v43, %s3973_s29  ;;  %1661 = vrot.lane.b32.xlu0 %v3686_v43, %s3974_s19  ;;  %v3022_v46 = vpop.f32.mrb[19].mxu1  ;;  %v1664_v49 = vcombine.high %v3686_v43, %v3263_v1  ;;  %v1671_v55 = vrot.slane %v3686_v43, %v3454_v21 }
 0xbd3   : > { %v1678_v52 = vrot.slane %v1664_v49, %v3454_v21 }
 0xc43   : > { %v3692_v47 = vpop.permute.xlu0 %1661  ;;  %v1783_v51 = vpop.permute.xlu1 %1782 }
 0xc44   : > { %1784 = vrot.lane.b32.xlu0 %v3692_v47, %s3973_s29  ;;  %v1679_v48 = vcombine.high %v3692_v47, %v3263_v1  ;;  %v1686_v54 = vrot.slane %v3692_v47, %v3454_v21  ;;  %v1788_v17 = vcombine.high %v1783_v51, %v3263_v1  ;;  %v1795_v60 = vrot.slane %v1783_v51, %v3454_v21  ;;  %s2892_s29 = sshll.u32 %s3377_s26, 7 }
 0xc46   : > { %v1693_v50 = vrot.slane %v1679_v48, %v3454_v21  ;;  %v1694_v32 = vcombine.low %v1671_v55, %v1686_v54  ;;  %v1695_v58 = vcombine.high %v1671_v55, %v1686_v54  ;;  %v1802_v2 = vrot.slane %v1788_v17, %v3454_v21 }
 0xc48   : > { %v1710_v56 = vcombine.low %v1678_v52, %v1693_v50  ;;  %v1711_v57 = vcombine.high %v1678_v52, %v1693_v50  ;;  %v1702_v4 = vrot.slane %v1694_v32, %v3464_v33  ;;  %v1709_v6 = vrot.slane %v1695_v58, %v3464_v33 }
 0xc4a   : > { %v1718_v63 = vrot.slane %v1710_v56, %v3464_v33  ;;  %v1725_v0 = vrot.slane %v1711_v57, %v3464_v33  ;;  %v1730_v22 = vcombine.low %v1702_v4, %v1709_v6  ;;  %v2826_v23 = vcombine.high %v1702_v4, %v1709_v6 }
 0xc4c   : > { %v1746_v12 = vcombine.low %v1718_v63, %v1725_v0  ;;  %v2827_v15 = vcombine.high %v1718_v63, %v1725_v0  ;;  %v1737_v36 = vrot.slane %v1730_v22, %v3454_v21  ;;  %v1745_v37 = vrot.slane %v2826_v23, %v3454_v21 }
 0xc4e   : > { %v1753_v28 = vrot.slane %v1746_v12, %v3454_v21  ;;  %v1761_v29 = vrot.slane %v2827_v15, %v3454_v21  ;;  %v1762_v42 = vcombine.low %v1737_v36, %v1745_v37 }
 0xc50   : > { %v1770_v41 = vcombine.low %v1753_v28, %v1761_v29  ;;  %v1769_v51 = vrot.slane %v1762_v42, %v3464_v33 }
 0xc52   : > { %v1777_v48 = vrot.slane %v1770_v41, %v3464_v33 }
 0xc54   : > { %v1778_v52 = vcombine.low %v1769_v51, %v1777_v48  ;;  %v1779_v54 = vcombine.high %v1769_v51, %v1777_v48 }
 0xc56   : > { %v1780_v55 = vpack.c.bf16 %v1778_v52, %v1778_v52  ;;  %v1781_v56 = vpack.c.bf16 %v1779_v54, %v1779_v54 }
 0xcb6   : > { %v1785_v59 = vpop.permute.xlu0 %1784 }
 0xcb7   : > { %v1803_v61 = vcombine.high %v1785_v59, %v3263_v1  ;;  %v1810_v62 = vrot.slane %v1785_v59, %v3454_v21 }
 0xcb9   : > { %v1817_v13 = vrot.slane %v1803_v61, %v3454_v21  ;;  %v1818_v3 = vcombine.low %v1795_v60, %v1810_v62  ;;  %v1819_v9 = vcombine.high %v1795_v60, %v1810_v62 }
 0xcbb   : > { %v1826_v7 = vrot.slane %v1818_v3, %v3464_v33  ;;  %v1833_v8 = vrot.slane %v1819_v9, %v3464_v33  ;;  %v1834_v10 = vcombine.low %v1802_v2, %v1817_v13  ;;  %v1835_v11 = vcombine.high %v1802_v2, %v1817_v13 }
 0xcbd   : > { %v1842_v16 = vrot.slane %v1834_v10, %v3464_v33  ;;  %v1849_v18 = vrot.slane %v1835_v11, %v3464_v33  ;;  %v1854_v19 = vcombine.low %v1826_v7, %v1833_v8  ;;  %v2828_v20 = vcombine.high %v1826_v7, %v1833_v8 }
 0xcbf   : > { %v1861_v24 = vrot.slane %v1854_v19, %v3454_v21  ;;  %v1869_v25 = vrot.slane %v2828_v20, %v3454_v21  ;;  %v1870_v26 = vcombine.low %v1842_v16, %v1849_v18  ;;  %v2829_v27 = vcombine.high %v1842_v16, %v1849_v18 }
 0xcc1   : > { %v1877_v30 = vrot.slane %v1870_v26, %v3454_v21  ;;  %v1885_v31 = vrot.slane %v2829_v27, %v3454_v21  ;;  %v1886_v35 = vcombine.low %v1861_v24, %v1869_v25 }
 0xcc3   : > { %v1894_v38 = vcombine.low %v1877_v30, %v1885_v31  ;;  %v1893_v39 = vrot.slane %v1886_v35, %v3464_v33 }
 0xcc5   : > { %v1901_v40 = vrot.slane %v1894_v38, %v3464_v33 }
 0xcc7   : > { %v1902_v14 = vcombine.low %v1893_v39, %v1901_v40  ;;  %v1903_v44 = vcombine.high %v1893_v39, %v1901_v40 }
 0xcc9   : > { %v1904_v45 = vpack.c.bf16 %v1902_v14, %v1902_v14  ;;  %v1905_v46 = vpack.c.bf16 %v1903_v44, %v1903_v44 }
 0xccb   : > { %v2034_v49 = vsel %vm920_vm2, %v1904_v45, 0  ;;  %v2080_v50 = vsel %vm920_vm2, %v1905_v46, 0 }
 0xccc   : > { %3024 = vmatpush3.bf16.xpose.msra.mxu0 %v2034_v49  ;;  %3030 = vmatpush3.bf16.xpose.msra.mxu1 %v2080_v50 }
 0xccd   : > { %3035 = vmatprep.subr.bf16.mxu0 %v3263_v1  ;;  %3041 = vmatprep.subr.bf16.mxu1 %v3263_v1 }
 0xcd3   : > { %3026 = vmatmul.mubr.msk.bf16.vlgmr.msra.gmra.mrb[16].mxu0 %vm920_vm2, %v1780_v55  ;;  %3032 = vmatmul.mubr.msk.bf16.vlgmr.msra.gmra.mrb[20].mxu1 %vm920_vm2, %v1781_v56 }
 0xcd4   : > { %3037 = vmatprep.mubr.msk.bf16.mxu0 %vm3264_vm0, %v3263_v1  ;;  %3043 = vmatprep.mubr.msk.bf16.mxu1 %vm3264_vm0, %v3263_v1 }
 0xda6   : > { %v2070_v57 = vpop.f32.mrb[16].mxu0  ;;  %v2116_v17 = vpop.f32.mrb[20].mxu1 }
 0xda7   : > { %v2122_v32 = vsel %vm3508_vm3, -1e+09, %v2070_v57  ;;  %v2123_v58 = vsel %vm3508_vm3, -1e+09, %v2116_v17  ;;  %v3027_v59 = vpop.f32.mrb[17].mxu0  ;;  %v3033_v60 = vpop.f32.mrb[21].mxu1 }
 0xda8   : > { %v2073_v61 = vpop.f32.mrb[18].mxu0  ;;  %v2119_v62 = vpop.f32.mrb[22].mxu1  ;;  %v2127_v63 = vsel %vm1017_vm4, %v2123_v58, -inf  ;;  %v2124_v0 = vsel %vm1017_vm4, %v2122_v32, -inf  ;;  %v3148_v60 = vld [vmem:[%s3969_s5 + $0x10] sm:$0xff]  }
 0xda9   : > { %2128 = vmax.xlane.f32.xlu0 %v2127_v63  ;;  %v3034_v2 = vpop.f32.mrb[23].mxu1  ;;  %2125 = vmax.xlane.f32.xlu1 %v2124_v0  ;;  %v3028_v13 = vpop.f32.mrb[19].mxu0 }
 0xe36   : > { %v2129_v3 = vpop.xlane.xlu0 %2128  ;;  %v2126_v9 = vpop.xlane.xlu1 %2125 }
 0xe37   : > { %v2131_v4 = vsub.f32 %v2123_v58, %v2129_v3  ;;  %v2130_v6 = vsub.f32 %v2122_v32, %v2126_v9 }
 0xe39   : > { %v2134_v7 = vmul.f32 1.442695, %v2131_v4  ;;  %v2132_v8 = vmul.f32 1.442695, %v2130_v6 }
 0xe3b   : > { %3172 = vpow2.f32 %v2134_v7 }
 0xe3c   : > { %3174 = vpow2.f32 %v2132_v8 }
 0xe45   : > { %v3173_v34 = vpop.eup %3172 }
 0xe46   : > { %v3175_v10 = vpop.eup %3174  ;;  %v2139_v11 = vsel %vm1017_vm4, %v3173_v34, 0.0 }
 0xe47   : > { %2140 = vadd.xlane.f32.xlu1 %v2139_v11  ;;  %v2136_v12 = vsel %vm1017_vm4, %v3175_v10, 0.0 }
 0xe48   : > { %2137 = vadd.xlane.f32.xlu0 %v2136_v12 }
 0xe58   : > { %1908 = vrot.lane.b32.xlu1 %v3692_v47, %s3972_s20 }
 0xe5e   : > { %1906 = vrot.lane.b32.xlu0 %v3686_v43, %s3972_s20 }
 0xed4   : > { %v2141_v15 = vpop.xlane.xlu1 %2140 }
 0xed5   : > { %v2138_v16 = vpop.xlane.xlu0 %2137  ;;  %3176 = vrcp.f32 %v2141_v15 }
 0xed6   : > { %3178 = vrcp.f32 %v2138_v16 }
 0xed8   : > { %v1909_v18 = vpop.permute.xlu1 %1908 }
 0xed9   : > { %v1907_v19 = vpop.permute.xlu0 %1906  ;;  %v1927_v20 = vcombine.high %v1909_v18, %v3263_v1  ;;  %v1934_v22 = vrot.slane %v1909_v18, %v3454_v21 }
 0xeda   : > { %v1912_v23 = vcombine.high %v1907_v19, %v3263_v1  ;;  %v1919_v24 = vrot.slane %v1907_v19, %v3454_v21 }
 0xedb   : > { %v1941_v25 = vrot.slane %v1927_v20, %v3454_v21  ;;  %v3149_v20 = vld [vmem:[%s3969_s5 + $0x18] sm:$0xff]   ;;  %s3888_s5 = scalar_lea.hbm %s3948_s15, %s2892_s29 }
 0xedc   : > { %v1926_v26 = vrot.slane %v1912_v23, %v3454_v21  ;;  %v1942_v47 = vcombine.low %v1919_v24, %v1934_v22  ;;  %v1943_v27 = vcombine.high %v1919_v24, %v1934_v22 }
 0xede   : > { %v1950_v43 = vrot.slane %v1942_v47, %v3464_v33  ;;  %v1957_v28 = vrot.slane %v1943_v27, %v3464_v33  ;;  %v1958_v29 = vcombine.low %v1926_v26, %v1941_v25  ;;  %v1959_v30 = vcombine.high %v1926_v26, %v1941_v25 }
 0xedf   : > { %v3177_v46 = vpop.eup %3176 }
 0xee0   : > { %v1966_v31 = vrot.slane %v1958_v29, %v3464_v33  ;;  %v1973_v35 = vrot.slane %v1959_v30, %v3464_v33  ;;  %v1978_v36 = vcombine.low %v1950_v43, %v1957_v28  ;;  %v2830_v37 = vcombine.high %v1950_v43, %v1957_v28  ;;  %v3179_v50 = vpop.eup %3178 }
 0xee1   : > { %v2144_v54 = vmul.f32 %v3179_v50, %v3175_v10  ;;  %v2145_v55 = vmul.f32 %v3177_v46, %v3173_v34 }
 0xee2   : > { %v1985_v38 = vrot.slane %v1978_v36, %v3454_v21  ;;  %v1994_v39 = vcombine.low %v1966_v31, %v1973_v35  ;;  %v2831_v40 = vcombine.high %v1966_v31, %v1973_v35  ;;  %v1993_v41 = vrot.slane %v2830_v37, %v3454_v21 }
 0xee3   : > { %v2146_v58 = vpack.c.bf16 %v2144_v54, %v2144_v54  ;;  %v2147_v59 = vpack.c.bf16 %v2145_v55, %v2145_v55  ;;  %v3150_v55 = vld [vmem:[%s3942_s9 + $0x30] sm:$0xff]  }
 0xee4   : > { %v2001_v42 = vrot.slane %v1994_v39, %v3454_v21  ;;  %v2009_v14 = vrot.slane %v2831_v40, %v3454_v21  ;;  %v2010_v44 = vcombine.low %v1985_v38, %v1993_v41 }
 0xee6   : > { %v2018_v45 = vcombine.low %v2001_v42, %v2009_v14  ;;  %v2017_v48 = vrot.slane %v2010_v44, %v3464_v33 }
 0xee8   : > { %v2025_v49 = vrot.slane %v2018_v45, %v3464_v33 }
 0xeea   : > { %v2026_v51 = vcombine.low %v2017_v48, %v2025_v49  ;;  %v2027_v52 = vcombine.high %v2017_v48, %v2025_v49 }
 0xeec   : > { %v2028_v56 = vpack.c.bf16 %v2026_v51, %v2026_v51  ;;  %v2029_v57 = vpack.c.bf16 %v2027_v52, %v2027_v52 }
 0xeee   : > { %v2152_v17 = vsel %vm1045_vm5, %v2028_v56, 0  ;;  %v2198_v32 = vsel %vm1045_vm5, %v2029_v57, 0  ;;  %v3151_v56 = vld [vmem:[%s3942_s9 + $0x38] sm:$0xff]   ;;  %v3153_v57 = vld [vmem:[%s3942_s9 + $0x48] sm:$0xff]  }
 0xeef   : > { %3036 = vmatpush3.bf16.msra.mxu0 %v2152_v17  ;;  %3042 = vmatpush3.bf16.msra.mxu1 %v2198_v32  ;;  %v3154_v17 = vld [vmem:[%s3942_s9 + $0x50] sm:$0xff]  }
 0xef0   : > { %3047 = vmatprep.subr.bf16.mxu0 %v3263_v1  ;;  %3055 = vmatprep.subr.bf16.mxu1 %v3263_v1 }
 0xef2   : > { %3038 = vmatmul.mubr.msk.bf16.vlgmr.msra.gmra.mrb[20].mxu0 %vm1017_vm4, %v2146_v58  ;;  %3044 = vmatmul.mubr.msk.bf16.vlgmr.msra.gmra.mrb[24].mxu1 %vm1017_vm4, %v2147_v59 }
 0xef3   : > { %3051 = vmatprep.mubr.msk.bf16.mxu0 %vm3264_vm0, %v3263_v1  ;;  %3067 = vmatprep.mubr.msk.bf16.mxu1 %vm3264_vm0, %v3263_v1 }
 0xef4   : > { %3048 = vmatpush3.bf16.msra.mxu0 %v3148_v60  ;;  %3056 = vmatpush3.bf16.msra.mxu1 %v3150_v55  ;;  %v3155_v60 = vld [vmem:[%s3942_s9 + $0x58] sm:$0xff]  }
 0xef5   : > { %3049 = vmatprep.subr.bf16.mxu0 %v3263_v1  ;;  %3057 = vmatprep.subr.bf16.mxu1 %v3263_v1 }
 0xef8   : > { %3050 = vmatpush3.bf16.msra.mxu0 %v3149_v20  ;;  %3058 = vmatpush3.bf16.msra.mxu1 %v3151_v56  ;;  %v2864_v20 = vld [vmem:[%s3943_s10 + $0x1] ss:$0 sm:$0xff] }
 0xef9   : > { %3071 = vmatprep.subr.bf16.mxu0 %v3263_v1  ;;  %3059 = vmatprep.subr.bf16.mxu1 %v3263_v1 }
 0xfc5   : > { %v2188_v61 = vpop.f32.mrb[20].mxu0  ;;  %v2234_v62 = vpop.f32.mrb[24].mxu1 }
 0xfc6   : > { %v2240_v63 = vcombine.high %v2188_v61, %v3263_v1  ;;  %v2247_v0 = vrot.slane %v2188_v61, %v3454_v21  ;;  %v2255_v2 = vcombine.high %v2234_v62, %v3263_v1  ;;  %v2262_v13 = vrot.slane %v2234_v62, %v3454_v21  ;;  %v3039_v3 = vpop.f32.mrb[21].mxu0  ;;  %v3045_v9 = vpop.f32.mrb[25].mxu1  ;;  %v2849_v62 = vld [vmem:[%s3940_s7 + $0x1] ss:$0 sm:$0xff] }
 0xfc7   : > { %v2191_v4 = vpop.f32.mrb[22].mxu0  ;;  %v2237_v6 = vpop.f32.mrb[26].mxu1  ;;  %v3157_v3 = vld [vmem:[%s3944_s11 + $0x28] sm:$0xff]  }
 0xfc8   : > { %v2254_v7 = vrot.slane %v2240_v63, %v3454_v21  ;;  %v2269_v8 = vrot.slane %v2255_v2, %v3454_v21  ;;  %v2270_v34 = vcombine.low %v2247_v0, %v2262_v13  ;;  %v2271_v10 = vcombine.high %v2247_v0, %v2262_v13  ;;  %v3040_v11 = vpop.f32.mrb[23].mxu0  ;;  %v3046_v12 = vpop.f32.mrb[27].mxu1  ;;  %v3156_v0 = vld [vmem:[%s3944_s11 + $0x20] sm:$0xff]  }
 0xfc9   : > { %v2850_v2 = vld [vmem:[%s3941_s8 + $0x1] ss:$0 sm:$0xff] }
 0xfca   : > { %v2278_v15 = vrot.slane %v2270_v34, %v3464_v33  ;;  %v2285_v16 = vrot.slane %v2271_v10, %v3464_v33  ;;  %v2286_v18 = vcombine.low %v2254_v7, %v2269_v8  ;;  %v2287_v19 = vcombine.high %v2254_v7, %v2269_v8 }
 0xfcc   : > { %v2294_v22 = vrot.slane %v2286_v18, %v3464_v33  ;;  %v2301_v23 = vrot.slane %v2287_v19, %v3464_v33  ;;  %v2306_v24 = vcombine.low %v2278_v15, %v2285_v16  ;;  %v2836_v25 = vcombine.high %v2278_v15, %v2285_v16  ;;  %v3158_v18 = vld [vmem:[%s3944_s11 + $0x30] sm:$0xff]   ;;  %v3159_v19 = vld [vmem:[%s3944_s11 + $0x38] sm:$0xff]  }
 0xfce   : > { %v2313_v26 = vrot.slane %v2306_v24, %v3454_v21  ;;  %v2321_v47 = vrot.slane %v2836_v25, %v3454_v21  ;;  %v2322_v27 = vcombine.low %v2294_v22, %v2301_v23  ;;  %v2837_v43 = vcombine.high %v2294_v22, %v2301_v23 }
 0xfd0   : > { %v2329_v28 = vrot.slane %v2322_v27, %v3454_v21  ;;  %v2337_v29 = vrot.slane %v2837_v43, %v3454_v21  ;;  %v2338_v30 = vcombine.low %v2313_v26, %v2321_v47  ;;  %v2843_v21 = vld [vmem:[%s3939_s6 + $0x1] ss:$0 sm:$0xff] }
 0xfd2   : > { %v2346_v31 = vcombine.low %v2329_v28, %v2337_v29  ;;  %v2345_v35 = vrot.slane %v2338_v30, %v3464_v33 }
 0xfd4   : > { %v2353_v36 = vrot.slane %v2346_v31, %v3464_v33 }
 0xfd6   : > { %v2355_v37 = vcombine.high %v2345_v35, %v2353_v36  ;;  %v2354_v38 = vcombine.low %v2345_v35, %v2353_v36 }
 0xfd8   : > { %2357 = vrot.lane.b32.xlu1 %v2355_v37, %s3975_s27 }
0x104a   : > { %v2358_v39 = vpop.permute.xlu1 %2357 }
0x104b   : > { %v2360_v40 = vsel %vm920_vm2, %v2354_v38, %v2358_v39 }
0x104c   : > { %v2361_v41 = vpack.c.bf16 %v2360_v40, %v2360_v40 }
0x104e   : > { %3052 = vmatmul.mubr.msk.bf16.vlgmr.msra.gmra.mrb[24].mxu0 %vm506_vm1, %v2361_v41 }
0x104f   : > { %3079 = vmatprep.mubr.msk.bf16.mxu0 %vm3264_vm0, %v3263_v1  ;;  %3072 = vmatpush3.bf16.msra.mxu0 %v3156_v0 }
0x1050   : > { %3073 = vmatprep.subr.bf16.mxu0 %v3263_v1 }
0x1053   : > { %3074 = vmatpush3.bf16.msra.mxu0 %v3157_v3 }
0x1054   : > { %3075 = vmatprep.subr.bf16.mxu0 %v3263_v1 }
0x1057   : > { %3076 = vmatpush3.bf16.msra.mxu0 %v3158_v18 }
0x1058   : > { %3077 = vmatprep.subr.bf16.mxu0 %v3263_v1 }
0x105b   : > { %3078 = vmatpush3.bf16.msra.mxu0 %v3159_v19 }
0x1121   : > { %v2424_v42 = vpop.f32.mrb[24].mxu0 }
0x1122   : > { %v2425_v14 = vadd.f32 %v2843_v21, %v2424_v42  ;;  %v3053_v33 = vpop.f32.mrb[25].mxu0 }
0x1123   : > { %v2427_v44 = vpop.f32.mrb[26].mxu0 }
0x1124   : > { %v3054_v45 = vpop.f32.mrb[27].mxu0  ;;  %v2430_v46 = vadd.f32 %v2425_v14, %v3676_v5  ;;  %v3152_v5 = vld [vmem:[%s3942_s9 + $0x40] sm:$0xff]  }
0x1125   : > { %3060 = vmatpush3.bf16.msra.mxu1 %v3152_v5  ;;  %v2889_v44 = vld [vmem:[%s3946_s13 + $0x1] ss:$0 sm:$0xff] }
0x1126   : > { %v2435_v48 = vsel %vm506_vm1, %v2430_v46, 0.0  ;;  %3061 = vmatprep.subr.bf16.mxu1 %v3263_v1 }
0x1127   : > { %2436 = vadd.xlane.f32.xlu0 %v2435_v48 }
0x1129   : > { %3062 = vmatpush3.bf16.msra.mxu1 %v3153_v57 }
0x112a   : > { %3063 = vmatprep.subr.bf16.mxu1 %v3263_v1 }
0x112d   : > { %3064 = vmatpush3.bf16.msra.mxu1 %v3154_v17 }
0x112e   : > { %3065 = vmatprep.subr.bf16.mxu1 %v3263_v1  ;;  %v2881_v1 = vld [vmem:[%s3945_s12 + $0x1] ss:$0 sm:$0xff] }
0x1131   : > { %3066 = vmatpush3.bf16.msra.mxu1 %v3155_v60 }
0x11b4   : > { %v2437_v49 = vpop.xlane.xlu0 %2436 }
0x11b5   : > { %v2438_v50 = vmul.f32 0.03125, %v2437_v49 }
0x11b7   : > { %v2439_v51 = vsub.f32 %v2430_v46, %v2438_v50  ;;  %v2890_v46 = vld [vmem:[%s3947_s14 + $0x1] ss:$0 sm:$0xff] }
0x11b9   : > { %v2440_v52 = vmul.f32 %v2439_v51, %v2439_v51 }
0x11bb   : > { %v2441_v54 = vsel %vm506_vm1, %v2440_v52, 0.0 }
0x11bc   : > { %2442 = vadd.xlane.f32.xlu1 %v2441_v54 }
0x1249   : > { %v2443_v32 = vpop.xlane.xlu1 %2442 }
0x124a   : > { %v2444_v58 = vmul.f32 0.03125, %v2443_v32 }
0x124c   : > { %v2445_v59 = vadd.f32 1e-05, %v2444_v58 }
0x124e   : > { %3180 = vrsqrt.f32 %v2445_v59 }
0x1258   : > { %v3181_v61 = vpop.eup %3180 }
0x1259   : > { %v2447_v63 = vmul.f32 %v3181_v61, %v2439_v51 }
0x125b   : > { %v2454_v13 = vmul.f32 %v2849_v62, %v2447_v63 }
0x125d   : > { %v2461_v9 = vadd.f32 %v2850_v2, %v2454_v13 }
0x125f   : > { %v2462_v4 = vsel %vm3624_vm6, 0.0, %v2461_v9 }
0x1260   : > { %2470 = vrot.lane.b32.xlu0 %v2462_v4, %s3976_s22  ;;  %v2467_v6 = vrot.slane %v2462_v4, 1  ;;  %v2464_v8 = vrot.slane %v2462_v4, 7  ;;  %s2777_s22 = sshll.u32 %s463_s30, 3 }
0x1261   : > { %s465_s19 = scalar_lea.vmem [#allocation4], %s2777_s22  ;;  %s3272_s22 = smov [#allocation4]  }
0x1262   : > { %v2469_v7 = vsel %vm1364_vm7, %v2467_v6, 0.0  ;;  %v2466_v10 = vsel %vm1360_vm8, 0.0, %v2464_v8  ;;  %s2714_s1 = sshll.u32 %s465_s19, 4  ;;  %s3200_s4 = sshll.u32 %s3272_s22, 4  ;;  %s3890_s1 = int_to_ptr.vmem [resolvable:$true] %s2714_s1  ;;  %s3201_s4 = int_to_ptr.vmem [resolvable:$false] %s3200_s4 }
0x1263   : > { %2474 = vrot.lane.b32.xlu1 %v2469_v7, %s3972_s20  ;;  %s3196_s26 = scalar_lea.vmem %s3890_s1, 128  ;;  %s3202_s2 = scalar_lea.vmem %s3201_s4, 256 }
0x1264   : > { %p3197_p2 = scmp.ne.s32.totalorder %s3890_s1, %s3196_s26  ;;  %p3203_p5 = scmp.lt.s32.totalorder %s3890_s1, %s3201_s4 }
0x1265   : > { %p3204_p6 = scmp.lt.s32.totalorder %s3202_s2, %s3196_s26 }
0x1266   : > { %p3198_p3 = pnand %p3197_p2, %p3394_p10 }
0x1267   : > { %p3205_p7 = por %p3204_p6, %p3203_p5 }
0x1268   : > { %p3199_p4 = pneg %p3198_p3 }
0x126a   : > { %p3206_p8 = pnand %p3205_p7, %p3199_p4 }
0x12d2   : > { %v2471_v34 = vpop.permute.xlu0 %2470 }
0x12d3   : > { %v2477_v11 = vsel %vm506_vm1, %v2466_v10, %v2471_v34 }
0x12d5   : > { %v2475_v12 = vpop.permute.xlu1 %2474 }
0x12d6   : > { %v2478_v15 = vsel %vm1374_vm9, %v2477_v11, %v2475_v12 }
0x12d7   : > { %v2479_v16 = vpack.c.bf16 %v2478_v15, %v2478_v15 }
0x12d9   : > { %3068 = vmatmul.mubr.msk.bf16.vlgmr.msra.gmra.mrb[28].mxu1 %vm1432_vm10, %v2479_v16 }
0x13ac   : > { %v2574_v22 = vpop.f32.mrb[28].mxu1 }
0x13ad   : > { %v2575_v23 = vadd.f32 %v2864_v20, %v2574_v22  ;;  %v3069_v24 = vpop.f32.mrb[29].mxu1 }
0x13ae   : > { %v2577_v25 = vpop.f32.mrb[30].mxu1 }
0x13af   : > { %v2580_v26 = vmax.f32 %v2575_v23, 0.0  ;;  %v3070_v47 = vpop.f32.mrb[31].mxu1 }
0x13b1   : > { %v2581_v27 = vpack.c.bf16 %v2580_v26, %v2580_v26 }
0x13b3   : > { %3080 = vmatmul.mubr.msk.bf16.vlgmr.msra.gmra.mrb[28].mxu0 %vm1374_vm9, %v2581_v27 }
0x1486   : > { %v2660_v43 = vpop.f32.mrb[28].mxu0 }
0x1487   : > { %v2661_v28 = vadd.f32 %v2881_v1, %v2660_v43  ;;  %v3081_v29 = vpop.f32.mrb[29].mxu0 }
0x1488   : > { %v2663_v30 = vpop.f32.mrb[30].mxu0 }
0x1489   : > { %v3082_v31 = vpop.f32.mrb[31].mxu0  ;;  %v2666_v35 = vadd.f32 %v2661_v28, %v2462_v4 }
0x148b   : > { %v2671_v36 = vsel %vm506_vm1, %v2666_v35, 0.0 }
0x148c   : > { %2672 = vadd.xlane.f32.xlu0 %v2671_v36 }
0x1519   : > { %v2673_v37 = vpop.xlane.xlu0 %2672 }
0x151a   : > { %v2674_v38 = vmul.f32 0.03125, %v2673_v37 }
0x151c   : > { %v2675_v39 = vsub.f32 %v2666_v35, %v2674_v38 }
0x151e   : > { %v2676_v40 = vmul.f32 %v2675_v39, %v2675_v39 }
0x1520   : > { %v2677_v41 = vsel %vm506_vm1, %v2676_v40, 0.0 }
0x1521   : > { %2678 = vadd.xlane.f32.xlu1 %v2677_v41 }
0x15ae   : > { %v2679_v21 = vpop.xlane.xlu1 %2678 }
0x15af   : > { %v2680_v42 = vmul.f32 0.03125, %v2679_v21 }
0x15b1   : > { %v2681_v14 = vadd.f32 1e-05, %v2680_v42 }
0x15b3   : > { %3182 = vrsqrt.f32 %v2681_v14 }
0x15bd   : > { %v3183_v33 = vpop.eup %3182 }
0x15be   : > { %v2683_v45 = vmul.f32 %v3183_v33, %v2675_v39 }
0x15c0   : > { %v2690_v48 = vmul.f32 %v2889_v44, %v2683_v45 }
0x15c2   : > { %v2697_v49 = vadd.f32 %v2890_v46, %v2690_v48 }
0x15c4   : > { %v2698_v50 = vsel %vm3624_vm6, 0.0, %v2697_v49 }
0x15c5   : > { %2699 = vst.msk [vmem:[%s465_s19] sm:$0xff] %vm506_vm1, %v2698_v50 }
0x15c6   : > { %3209 = shalt.err (!%p3206_p8)
}
0x15c7   : > { %s3210_s30 = scalar_lea.hbm %s3888_s5, 128  ;;  %s3214_s29 = scalar_lea.hbm %s3948_s15, 256 }
0x15c8   : > { %p3211_p9 = scmp.ne.s32.totalorder %s3888_s5, %s3210_s30  ;;  %p3215_p0 = scmp.lt.u32.totalorder %s3888_s5, %s3948_s15 }
0x15c9   : > { %p3216_p1 = scmp.lt.u32.totalorder %s3214_s29, %s3210_s30  ;;  %p3218_p3 = scmp.lt.u32.totalorder %s3210_s30, %s3888_s5 }
0x15ca   : > { %p3212_p12 = pnand %p3211_p9, %p3394_p10 }
0x15cb   : > { %p3217_p2 = por %p3216_p1, %p3215_p0 }
0x15cc   : > { %p3213_p13 = pneg %p3212_p12 }
0x15cd   : > { %p3219_p4 = por %p3218_p3, %p3217_p2 }
0x15cf   : > { %p3220_p5 = pnand %p3219_p4, %p3213_p13 }
0x15d1   : > { %3223 = shalt.err (!%p3220_p5)
}
0x15d2   : > { %3083 = dma.vmem_to_hbm [thread:$0]  (%p3394_p10), %s3890_s1, 128, %s3888_s5, %s2701_s3  }
0x15d3 PF: > { %p3089_p6 = scmp.ge.s32.totalorder %s3260_s25, 2  ;;  %s2726_s26 = sand.u32 1, %s3248_s23  }
0x15d4   : > { %s2727_s22 = scalar_lea.sflag [#allocation5], %s2726_s26 }
0x15d5   : > { %p3086_p7 = pnand %p3089_p6, %p3398_p11 }
0x15d7   : > { %3243 = dma.done.wait (!%p3086_p7), %s2727_s22, 128  }
0x15d8   : > { %3245 = vsyncadd (!%p3086_p7), %s2727_s22, 4294967168  ;;  %p31_p8 = scmp.ge.s32.totalorder %s3381_s28, 4   ;;  %s3977_s23 = smov %s3252_s24 }
0x15d9   : > { %s3978_s24 = smov %s3256_s0  ;;  %s3979_s0 = smov %s3392_s16 }
0x15da   : > { %s3980_s25 = smov %s3381_s28  ;;  %33 = sbr.rel (!%p31_p8) target bundleno = 20 (0x14), region = 123 }
0x15e1   :  { %2732 = vsyncpa [#allocation5], 1 }
0x15e2   :  { %2734 = vsyncpa [#allocation5 + $0x1], 1 }

</bundles_post_ra>
